<compile_context>
chip_gen: v6e
topology: v6e:2x2x1
jax: 0.10.0
libtpu: 0.0.40
codegen_flags: <defaults>
</compile_context>

<pallas_src>
import functools

import numpy as np
import jax
import jax.numpy as jnp
from jax import lax
from jax.experimental import pallas as pl
from jax.experimental.pallas import tpu as pltpu


_NEG_INF = -1e30                 # finite "-inf" (avoids inf-inf NaNs under masking)
_GELU_C = 0.7978845608028654     # sqrt(2/pi)


def _round_up(a, b):
    return (a + b - 1) // b * b


def _vmem_limit_bytes():
    """Generation-aware scoped-VMEM budget (v7x has 64 MiB/TC, v5e/v6e 128 MiB)."""
    try:
        phys = int(pltpu.get_tpu_info().vmem_capacity_bytes)
        return min(phys * 3 // 4, 100 * 1024 * 1024)
    except Exception:
        return 32 * 1024 * 1024  # conservative: safe on every generation


def get_position_encoding(seq_len, d, n=10000):
    """numpy port of getPositionEncoding() from the PyTorch model."""
    p = np.zeros((seq_len, d), dtype=np.float32)
    for k in range(seq_len):
        for i in range(int(d / 2)):
            denom = np.power(n, 2 * i / d)
            p[k, 2 * i] = np.sin(k / denom)
            p[k, 2 * i + 1] = np.cos(k / denom)
    return p


def _layer_norm(x, gamma, beta, eps):
    mean = jnp.mean(x, axis=-1, keepdims=True)
    var = jnp.mean((x - mean) * (x - mean), axis=-1, keepdims=True)
    return (x - mean) * lax.rsqrt(var + eps) * gamma + beta


def _gelu_tanh(x):
    # TODO(synk): torch nn.GELU() is the exact erf form; tanh approximation used for
    # guaranteed Mosaic lowering (max abs deviation ~3e-3).
    return 0.5 * x * (1.0 + jnp.tanh(_GELU_C * (x + 0.044715 * x * x * x)))


# --------------------------------------------------------------------------------------
# Fused transformer layer kernel:
#   y  = x + b_out + MHA(LN1(x)) @ W_out
#   y2 = y + b2   + GELU(LN2(y) @ W1 + b1) @ W2
#   (last layer only)  logits = LN_f(y2[cls]) @ W_head + b_head
# --------------------------------------------------------------------------------------
def _make_layer_kernel(*, heads, dim_head, inner, seq_tile, n_pad, n_valid, eps,
                       compute_dtype, needs_mask, approx_recip, with_head):
    def kernel(*refs):
        if with_head:
            (x_ref, g1_ref, be1_ref, wq_ref, wkv_ref, wo_ref, bo_ref,
             g2_ref, be2_ref, w1_ref, bb1_ref, w2_ref, bb2_ref,
             gf_ref, bf_ref, wh_ref, bh_ref,
             logits_ref, xn_sc, k_sc, v_sc) = refs
        else:
            (x_ref, g1_ref, be1_ref, wq_ref, wkv_ref, wo_ref, bo_ref,
             g2_ref, be2_ref, w1_ref, bb1_ref, w2_ref, bb2_ref,
             o_ref, xn_sc, k_sc, v_sc) = refs

        qi = pl.program_id(1)
        f32 = jnp.float32

        # ---- once per batch element (qi == 0): LN over the full sequence + fused
        #      K|V projection, cached in VMEM scratch and reused by every q block ----
        @pl.when(qi == 0)
        def _build_kv_cache():
            xs = x_ref[0].astype(f32)                                       # (n_pad, dim)
            xn = _layer_norm(xs, g1_ref[0].astype(f32), be1_ref[0].astype(f32), eps)
            xn_c = xn.astype(compute_dtype)
            xn_sc[...] = xn_c
            kv = jnp.dot(xn_c, wkv_ref[...],
                         preferred_element_type=f32)                        # (n_pad, 2*inner)
            k_sc[...] = kv[:, :inner].astype(k_sc.dtype)
            v_sc[...] = kv[:, inner:].astype(v_sc.dtype)

        # ---- current q block: residual rows + cached LN rows ----
        if seq_tile == n_pad:                    # single q block (small-sequence regime)
            x_blk = x_ref[0].astype(f32)         # (tq, dim) residual
            xn_q = xn_sc[...]                    # (tq, dim) cached LN(x)
        else:
            q_start = pl.multiple_of(qi * seq_tile, seq_tile)
            x_blk = x_ref[0, pl.ds(q_start, seq_tile), :].astype(f32)
            xn_q = xn_sc[pl.ds(q_start, seq_tile), :]

        # fused all-head Q projection (scale folded into W_q on the host)
        q = jnp.dot(xn_q, wq_ref[...], preferred_element_type=f32).astype(compute_dtype)
        k = k_sc[...]                                                       # (n_pad, inner)
        v = v_sc[...]

        if needs_mask:
            key_mask = lax.broadcasted_iota(jnp.int32, (1, n_pad), 1) < n_valid

        # per-head attention with a plain row softmax (full KV resident, so no
        # online-softmax m/l/alpha bookkeeping).  H is small -> static unroll.
        head_out = []
        for h in range(heads):
            sl = slice(h * dim_head, (h + 1) * dim_head)
            s = lax.dot_general(q[:, sl], k[:, sl],
                                dimension_numbers=(((1,), (1,)), ((), ())),
                                preferred_element_type=f32)                 # (tq, n_pad)
            if needs_mask:
                s = jnp.where(key_mask, s, _NEG_INF)
            p = jnp.exp(s - jnp.max(s, axis=-1, keepdims=True))
            p = p * pl.reciprocal(jnp.sum(p, axis=-1, keepdims=True), approx=approx_recip)
            head_out.append(jnp.dot(p.astype(compute_dtype), v[:, sl],
                                    preferred_element_type=f32))            # (tq, dh)
        # lane-dense (tq, inner) head-output slab -> ONE output projection
        attn = jnp.concatenate(head_out, axis=-1).astype(compute_dtype)

        y = x_blk + bo_ref[0].astype(f32) + jnp.dot(attn, wo_ref[...],
                                                    preferred_element_type=f32)

        # ---- FeedForward: LN -> Linear -> GELU -> Linear -> + residual ----
        yn = _layer_norm(y, g2_ref[0].astype(f32), be2_ref[0].astype(f32), eps)
        h1 = jnp.dot(yn.astype(compute_dtype), w1_ref[...],
                     preferred_element_type=f32) + bb1_ref[0].astype(f32)
        h1 = _gelu_tanh(h1)
        y = y + bb2_ref[0].astype(f32) + jnp.dot(h1.astype(compute_dtype), w2_ref[...],
                                                 preferred_element_type=f32)

        if with_head:
            # fused final LayerNorm + classifier on the cls token (row 0 of q block 0)
            cls = y[0:1, :]
            cls = _layer_norm(cls, gf_ref[0].astype(f32), bf_ref[0].astype(f32), eps)
            logits = jnp.dot(cls, wh_ref[...].astype(f32),
                             preferred_element_type=f32) + bh_ref[0].astype(f32)
            logits_ref[0] = logits.astype(logits_ref.dtype)
        else:
            o_ref[0] = y.astype(o_ref.dtype)

    return kernel


def _fused_layer(x, lparams, head_params, *, heads, dim_head, seq_tile, n_valid, eps,
                 compute_dtype, approx_recip, vmem_limit):
    """One pallas_call = one transformer layer (attention + FF, + head if last)."""
    B, n_pad, dim = x.shape
    inner = heads * dim_head
    a, f = lparams["attn"], lparams["ff"]
    hidden = f["w1"].shape[1]
    with_head = head_params is not None
    n_q = 1 if with_head else n_pad // seq_tile       # last layer only needs q block 0
    needs_mask = n_pad != n_valid
    scale = float(dim_head) ** -0.5

    # host-side weight prep: fold scale into W_q, fuse K|V, cast once to the MXU dtype
    wq = (a["w_qkv"][:, :inner] * scale).astype(compute_dtype)        # (dim, inner)
    wkv = a["w_qkv"][:, inner:].astype(compute_dtype)                 # (dim, 2*inner)
    wo = a["w_out"].astype(compute_dtype)                             # (inner, dim)
    w1 = f["w1"].astype(compute_dtype)
    w2 = f["w2"].astype(compute_dtype)

    kernel = _make_layer_kernel(
        heads=heads, dim_head=dim_head, inner=inner, seq_tile=seq_tile, n_pad=n_pad,
        n_valid=n_valid, eps=eps, compute_dtype=compute_dtype, needs_mask=needs_mask,
        approx_recip=approx_recip, with_head=with_head)

    const2 = lambda b, qi: (0, 0)
    in_specs = [
        # whole sequence per batch element; constant across qi -> DMA'd once per batch
        pl.BlockSpec((1, n_pad, dim), lambda b, qi: (b, 0, 0)),
        pl.BlockSpec((1, dim), const2), pl.BlockSpec((1, dim), const2),   # attn LN
        pl.BlockSpec((dim, inner), const2),                               # W_q (scaled)
        pl.BlockSpec((dim, 2 * inner), const2),                           # W_kv (fused)
        pl.BlockSpec((inner, dim), const2),                               # W_out
        pl.BlockSpec((1, dim), const2),                                   # b_out
        pl.BlockSpec((1, dim), const2), pl.BlockSpec((1, dim), const2),   # ff LN
        pl.BlockSpec((dim, hidden), const2), pl.BlockSpec((1, hidden), const2),
        pl.BlockSpec((hidden, dim), const2), pl.BlockSpec((1, dim), const2),
    ]
    args = [x, a["gamma"], a["beta"], wq, wkv, wo, a["b_out"],
            f["gamma"], f["beta"], w1, f["b1"], w2, f["b2"]]

    if with_head:
        n_cls = head_params["w_head"].shape[1]
        in_specs += [pl.BlockSpec((1, dim), const2), pl.BlockSpec((1, dim), const2),
                     pl.BlockSpec((dim, n_cls), const2), pl.BlockSpec((1, n_cls), const2)]
        args += [head_params["final_gamma"], head_params["final_beta"],
                 head_params["w_head"], head_params["b_head"]]
        out_shape = jax.ShapeDtypeStruct((B, 1, n_cls), jnp.float32)
        out_specs = pl.BlockSpec((1, 1, n_cls), lambda b, qi: (b, 0, 0))
    else:
        out_shape = jax.ShapeDtypeStruct((B, n_pad, dim), x.dtype)
        out_specs = pl.BlockSpec((1, seq_tile, dim), lambda b, qi: (b, qi, 0))

    return pl.pallas_call(
        kernel,
        out_shape=out_shape,
        grid_spec=pltpu.PrefetchScalarGridSpec(
            num_scalar_prefetch=0,
            grid=(B, n_q),
            in_specs=in_specs,
            out_specs=out_specs,
            scratch_shapes=[
                pltpu.VMEM((n_pad, dim), compute_dtype),     # cached LN(x)
                pltpu.VMEM((n_pad, inner), compute_dtype),   # cached K (all heads)
                pltpu.VMEM((n_pad, inner), compute_dtype),   # cached V (all heads)
            ],
        ),
        compiler_params=pltpu.CompilerParams(
            # B even (demo B=2) keeps both v7x TensorCores busy; qi is "arbitrary"
            # because the KV cache is built at qi == 0 and reused.
            dimension_semantics=("parallel", "arbitrary"),
            vmem_limit_bytes=vmem_limit),
    )(*args)


# --------------------------------------------------------------------------------------
# Full MSA_HEAD forward (Pallas) and a pure-JAX reference
# --------------------------------------------------------------------------------------
def msa_head_forward(features, params, *, heads, dim_head, eps=1e-5,
                     compute_dtype=jnp.bfloat16):
    """features: (B, dim, Hp, Wp) float32 -> logits (B, num_classes)."""
    B, dim, hp, wp = features.shape
    approx_recip = np.dtype(compute_dtype) == np.dtype(jnp.bfloat16)

    # ---- embedding assembly (pure data movement, kept in plain JAX) ----
    x = jnp.transpose(features, (0, 2, 3, 1)).reshape(B, hp * wp, dim)
    n = x.shape[1]
    cls = jnp.broadcast_to(params["cls_token"], (B, 1, dim))
    x = jnp.concatenate([cls, x], axis=1)
    x = x + params["pos_embedding"][None, :n + 1, :]
    n_tokens = n + 1                                  # dropout p=0.0 -> identity

    # ---- sequence tiling: multiple of 16 (bf16 sublane packing), <= 128 per q block ----
    seq_tile = min(_round_up(n_tokens, 16), 128)
    n_pad = _round_up(n_tokens, seq_tile)
    if n_pad != n_tokens:
        x = jnp.pad(x, ((0, 0), (0, n_pad - n_tokens), (0, 0)))

    vmem_limit = _vmem_limit_bytes()
    layers = params["layers"]
    if not layers:
        raise ValueError("msa_head_forward requires depth >= 1")

    head_params = {"final_gamma": params["final_gamma"],
                   "final_beta": params["final_beta"],
                   "w_head": params["w_head"],
                   "b_head": params["b_head"]}

    for li, layer in enumerate(layers):
        last = li == len(layers) - 1
        x = _fused_layer(x, layer, head_params if last else None,
                         heads=heads, dim_head=dim_head, seq_tile=seq_tile,
                         n_valid=n_tokens, eps=eps, compute_dtype=compute_dtype,
                         approx_recip=approx_recip, vmem_limit=vmem_limit)
    return x[:, 0, :]                                 # (B, num_classes)


def msa_head_reference(features, params, *, heads, dim_head, eps=1e-5):
    """Pure-JAX reference mirroring the PyTorch forward."""
    B, dim, hp, wp = features.shape
    inner = heads * dim_head
    scale = float(dim_head) ** -0.5

    x = jnp.transpose(features, (0, 2, 3, 1)).reshape(B, hp * wp, dim)
    n = x.shape[1]
    cls = jnp.broadcast_to(params["cls_token"], (B, 1, dim))
    x = jnp.concatenate([cls, x], axis=1)
    x = x + params["pos_embedding"][None, :n + 1, :]

    def ln(t, g, b):
        mu = jnp.mean(t, axis=-1, keepdims=True)
        var = jnp.mean((t - mu) ** 2, axis=-1, keepdims=True)
        return (t - mu) * lax.rsqrt(var + eps) * g + b

    for layer in params["layers"]:
        a = layer["attn"]
        xn = ln(x, a["gamma"][0], a["beta"][0])
        qkv = xn @ a["w_qkv"]
        q, k, v = jnp.split(qkv, 3, axis=-1)

        def split_heads(t):
            return t.reshape(B, -1, heads, dim_head).transpose(0, 2, 1, 3)

        q, k, v = map(split_heads, (q, k, v))
        dots = jnp.einsum("bhnd,bhmd->bhnm", q, k) * scale
        attn = jax.nn.softmax(dots, axis=-1)
        out = jnp.einsum("bhnm,bhmd->bhnd", attn, v)
        out = out.transpose(0, 2, 1, 3).reshape(B, -1, inner)
        x = out @ a["w_out"] + a["b_out"][0] + x

        f = layer["ff"]
        xn = ln(x, f["gamma"][0], f["beta"][0])
        hdn = _gelu_tanh(xn @ f["w1"] + f["b1"][0])
        x = hdn @ f["w2"] + f["b2"][0] + x

    x = ln(x, params["final_gamma"][0], params["final_beta"][0])
    return x[:, 0, :] @ params["w_head"] + params["b_head"][0]


if __name__ == "__main__":
    B = 2
    DIM = 32                  # channels == embedding dim
    HP = WP = 4               # spatial 4x4 -> 16 patches -> 17 tokens with cls
    HEADS, DIM_HEAD = 4, 16
    MLP_DIM = 64
    DEPTH = 2
    NUM_CLASSES = 10
    NUM_PATCHES = HP * WP
    INNER = HEADS * DIM_HEAD

    key = jax.random.PRNGKey(0)
    keys = iter(jax.random.split(key, 64))

    def nrm(shape, s=1.0):
        return s * jax.random.normal(next(keys), shape, dtype=jnp.float32)

    features = nrm((B, DIM, HP, WP))

    layers = []
    for _ in range(DEPTH):
        layers.append({
            "attn": {
                "gamma": 1.0 + 0.05 * nrm((1, DIM)),
                "beta": 0.05 * nrm((1, DIM)),
                "w_qkv": nrm((DIM, 3 * INNER), DIM ** -0.5),
                "w_out": nrm((INNER, DIM), INNER ** -0.5),
                "b_out": 0.05 * nrm((1, DIM)),
            },
            "ff": {
                "gamma": 1.0 + 0.05 * nrm((1, DIM)),
                "beta": 0.05 * nrm((1, DIM)),
                "w1": nrm((DIM, MLP_DIM), DIM ** -0.5),
                "b1": 0.05 * nrm((1, MLP_DIM)),
                "w2": nrm((MLP_DIM, DIM), MLP_DIM ** -0.5),
                "b2": 0.05 * nrm((1, DIM)),
            },
        })

    params = {
        "cls_token": nrm((1, 1, DIM)),
        "pos_embedding": jnp.asarray(get_position_encoding(NUM_PATCHES + 1, DIM),
                                     dtype=jnp.float32),
        "layers": layers,
        "final_gamma": 1.0 + 0.05 * nrm((1, DIM)),
        "final_beta": 0.05 * nrm((1, DIM)),
        "w_head": nrm((DIM, NUM_CLASSES), DIM ** -0.5),
        "b_head": 0.05 * nrm((1, NUM_CLASSES)),
    }

    y_ref = msa_head_reference(features, params, heads=HEADS, dim_head=DIM_HEAD)

    # exact path (f32 MXU operands) — correctness check
    y_f32 = msa_head_forward(features, params, heads=HEADS, dim_head=DIM_HEAD,
                             compute_dtype=jnp.float32)
    y_f32 = jax.block_until_ready(y_f32)
    assert y_f32.shape == (B, NUM_CLASSES)
    assert jnp.allclose(y_f32, y_ref, rtol=2e-2, atol=2e-2), "f32 kernel mismatch vs reference"

    # fast path (bf16 MXU operands, f32 accumulation) — v6e/v7x recommended config
    y_bf16 = msa_head_forward(features, params, heads=HEADS, dim_head=DIM_HEAD,
                              compute_dtype=jnp.bfloat16)
    y_bf16 = jax.block_until_ready(y_bf16)
    assert y_bf16.shape == (B, NUM_CLASSES)
    assert jnp.allclose(y_bf16, y_ref, rtol=1e-1, atol=1e-1), "bf16 kernel mismatch vs reference"

    print("KERNEL_OK")
</pallas_src>

<mosaic_0001>
module attributes {stable_mosaic.version = 11 : i64} {
  func.func @kernel(%arg0: i32, %arg1: i32, %arg2: memref<1x32x32xf32, #tpu.memory_space<vmem>>, %arg3: memref<1x32xf32, #tpu.memory_space<vmem>>, %arg4: memref<1x32xf32, #tpu.memory_space<vmem>>, %arg5: memref<32x64xf32, #tpu.memory_space<vmem>>, %arg6: memref<32x128xf32, #tpu.memory_space<vmem>>, %arg7: memref<64x32xf32, #tpu.memory_space<vmem>>, %arg8: memref<1x32xf32, #tpu.memory_space<vmem>>, %arg9: memref<1x32xf32, #tpu.memory_space<vmem>>, %arg10: memref<1x32xf32, #tpu.memory_space<vmem>>, %arg11: memref<32x64xf32, #tpu.memory_space<vmem>>, %arg12: memref<1x64xf32, #tpu.memory_space<vmem>>, %arg13: memref<64x32xf32, #tpu.memory_space<vmem>>, %arg14: memref<1x32xf32, #tpu.memory_space<vmem>>, %arg15: memref<1x32x32xf32, #tpu.memory_space<vmem>>, %arg16: memref<32x32xf32, #tpu.memory_space<vmem>>, %arg17: memref<32x64xf32, #tpu.memory_space<vmem>>, %arg18: memref<32x64xf32, #tpu.memory_space<vmem>>) attributes {dimension_semantics = [#tpu.dimension_semantics<parallel>, #tpu.dimension_semantics<arbitrary>], iteration_bounds = array<i64: 2, 1>, scalar_prefetch = 0 : i64, scratch_operands = 3 : i64, tpu.core_type = #tpu.core_type<tc>, window_params = [{transform_indices = @transform_0, window_bounds = array<i64: 1, 32, 32>}, {pipeline_mode = #tpu.pipeline_mode<synchronous>, transform_indices = @transform_1, window_bounds = array<i64: 1, 32>}, {pipeline_mode = #tpu.pipeline_mode<synchronous>, transform_indices = @transform_2, window_bounds = array<i64: 1, 32>}, {pipeline_mode = #tpu.pipeline_mode<synchronous>, transform_indices = @transform_3, window_bounds = array<i64: 32, 64>}, {pipeline_mode = #tpu.pipeline_mode<synchronous>, transform_indices = @transform_4, window_bounds = array<i64: 32, 128>}, {pipeline_mode = #tpu.pipeline_mode<synchronous>, transform_indices = @transform_5, window_bounds = array<i64: 64, 32>}, {pipeline_mode = #tpu.pipeline_mode<synchronous>, transform_indices = @transform_6, window_bounds = array<i64: 1, 32>}, {pipeline_mode = #tpu.pipeline_mode<synchronous>, transform_indices = @transform_7, window_bounds = array<i64: 1, 32>}, {pipeline_mode = #tpu.pipeline_mode<synchronous>, transform_indices = @transform_8, window_bounds = array<i64: 1, 32>}, {pipeline_mode = #tpu.pipeline_mode<synchronous>, transform_indices = @transform_9, window_bounds = array<i64: 32, 64>}, {pipeline_mode = #tpu.pipeline_mode<synchronous>, transform_indices = @transform_10, window_bounds = array<i64: 1, 64>}, {pipeline_mode = #tpu.pipeline_mode<synchronous>, transform_indices = @transform_11, window_bounds = array<i64: 64, 32>}, {pipeline_mode = #tpu.pipeline_mode<synchronous>, transform_indices = @transform_12, window_bounds = array<i64: 1, 32>}, {transform_indices = @transform_13, window_bounds = array<i64: 1, 32, 32>}]} {
    %c0_i32 = arith.constant 0 : i32
    %0 = arith.cmpi eq, %arg1, %c0_i32 : i32
    %1 = arith.extui %0 : i1 to i32
    %c0_i32_0 = arith.constant 0 : i32
    %2 = arith.cmpi ne, %1, %c0_i32_0 : i32
    scf.if %2 {
      %c0_62 = arith.constant 0 : index
      %c0_63 = arith.constant 0 : index
      %c0_64 = arith.constant 0 : index
      %159 = vector.load %arg2[%c0_62, %c0_63, %c0_64] : memref<1x32x32xf32, #tpu.memory_space<vmem>>, vector<1x32x32xf32>
      %160 = vector.shape_cast %159 : vector<1x32x32xf32> to vector<32x32xf32>
      %c0_65 = arith.constant 0 : index
      %c0_66 = arith.constant 0 : index
      %161 = vector.load %arg3[%c0_65, %c0_66] : memref<1x32xf32, #tpu.memory_space<vmem>>, vector<1x32xf32>
      %162 = vector.shape_cast %161 : vector<1x32xf32> to vector<32xf32>
      %c0_67 = arith.constant 0 : index
      %c0_68 = arith.constant 0 : index
      %163 = vector.load %arg4[%c0_67, %c0_68] : memref<1x32xf32, #tpu.memory_space<vmem>>, vector<1x32xf32>
      %164 = vector.shape_cast %163 : vector<1x32xf32> to vector<32xf32>
      %cst_69 = arith.constant dense<0.000000e+00> : vector<32xf32>
      %165 = vector.multi_reduction <add>, %160, %cst_69 [1] : vector<32x32xf32> to vector<32xf32>
      %166 = vector.shape_cast %165 : vector<32xf32> to vector<32x1xf32>
      %cst_70 = arith.constant 3.200000e+01 : f32
      %167 = vector.broadcast %cst_70 : f32 to vector<32x1xf32>
      %168 = arith.divf %166, %167 : vector<32x1xf32>
      %169 = vector.broadcast %168 : vector<32x1xf32> to vector<32x32xf32>
      %170 = arith.subf %160, %169 : vector<32x32xf32>
      %171 = vector.broadcast %168 : vector<32x1xf32> to vector<32x32xf32>
      %172 = arith.subf %160, %171 : vector<32x32xf32>
      %173 = arith.mulf %170, %172 : vector<32x32xf32>
      %cst_71 = arith.constant dense<0.000000e+00> : vector<32xf32>
      %174 = vector.multi_reduction <add>, %173, %cst_71 [1] : vector<32x32xf32> to vector<32xf32>
      %175 = vector.shape_cast %174 : vector<32xf32> to vector<32x1xf32>
      %cst_72 = arith.constant 3.200000e+01 : f32
      %176 = vector.broadcast %cst_72 : f32 to vector<32x1xf32>
      %177 = arith.divf %175, %176 : vector<32x1xf32>
      %178 = vector.broadcast %168 : vector<32x1xf32> to vector<32x32xf32>
      %179 = arith.subf %160, %178 : vector<32x32xf32>
      %cst_73 = arith.constant 9.99999974E-6 : f32
      %180 = vector.broadcast %cst_73 : f32 to vector<32x1xf32>
      %181 = arith.addf %177, %180 : vector<32x1xf32>
      %182 = math.rsqrt %181 : vector<32x1xf32>
      %183 = vector.broadcast %182 : vector<32x1xf32> to vector<32x32xf32>
      %184 = arith.mulf %179, %183 : vector<32x32xf32>
      %185 = vector.shape_cast %162 : vector<32xf32> to vector<1x32xf32>
      %186 = vector.broadcast %185 : vector<1x32xf32> to vector<32x32xf32>
      %187 = arith.mulf %184, %186 : vector<32x32xf32>
      %188 = vector.shape_cast %164 : vector<32xf32> to vector<1x32xf32>
      %189 = vector.broadcast %188 : vector<1x32xf32> to vector<32x32xf32>
      %190 = arith.addf %187, %189 : vector<32x32xf32>
      %c0_74 = arith.constant 0 : index
      %c0_75 = arith.constant 0 : index
      %191 = vector.load %arg16[%c0_74, %c0_75] : memref<32x32xf32, #tpu.memory_space<vmem>>, vector<32x32xf32>
      tpu.vector_store %arg16[%c0_74, %c0_75], %190 {strides = array<i32>} : memref<32x32xf32, #tpu.memory_space<vmem>>, vector<32x32xf32>,
      %c0_76 = arith.constant 0 : index
      %c0_77 = arith.constant 0 : index
      %192 = vector.load %arg6[%c0_76, %c0_77] : memref<32x128xf32, #tpu.memory_space<vmem>>, vector<32x128xf32>
      %cst_78 = arith.constant dense<0.000000e+00> : vector<32x128xf32>
      %193 = tpu.matmul %190, %192, %cst_78 {dimension_numbers = #tpu.dot_dimension_numbers<[1], [0], [0], [1], [0, 0, 1, 1], [], []>} : vector<32x32xf32>, vector<32x128xf32>, vector<32x128xf32> -> vector<32x128xf32>
      %194 = vector.extract_strided_slice %193 {offsets = [0, 0], sizes = [32, 64], strides = [1, 1]} : vector<32x128xf32> to vector<32x64xf32>
      %c0_79 = arith.constant 0 : index
      %c0_80 = arith.constant 0 : index
      %195 = vector.load %arg17[%c0_79, %c0_80] : memref<32x64xf32, #tpu.memory_space<vmem>>, vector<32x64xf32>
      tpu.vector_store %arg17[%c0_79, %c0_80], %194 {strides = array<i32>} : memref<32x64xf32, #tpu.memory_space<vmem>>, vector<32x64xf32>,
      %196 = vector.extract_strided_slice %193 {offsets = [0, 64], sizes = [32, 64], strides = [1, 1]} : vector<32x128xf32> to vector<32x64xf32>
      %c0_81 = arith.constant 0 : index
      %c0_82 = arith.constant 0 : index
      %197 = vector.load %arg18[%c0_81, %c0_82] : memref<32x64xf32, #tpu.memory_space<vmem>>, vector<32x64xf32>
      tpu.vector_store %arg18[%c0_81, %c0_82], %196 {strides = array<i32>} : memref<32x64xf32, #tpu.memory_space<vmem>>, vector<32x64xf32>,
    } else {
    }
    %c0 = arith.constant 0 : index
    %c0_1 = arith.constant 0 : index
    %c0_2 = arith.constant 0 : index
    %3 = vector.load %arg2[%c0, %c0_1, %c0_2] : memref<1x32x32xf32, #tpu.memory_space<vmem>>, vector<1x32x32xf32>
    %4 = vector.shape_cast %3 : vector<1x32x32xf32> to vector<32x32xf32>
    %c0_3 = arith.constant 0 : index
    %c0_4 = arith.constant 0 : index
    %5 = vector.load %arg16[%c0_3, %c0_4] : memref<32x32xf32, #tpu.memory_space<vmem>>, vector<32x32xf32>
    %c0_5 = arith.constant 0 : index
    %c0_6 = arith.constant 0 : index
    %6 = vector.load %arg5[%c0_5, %c0_6] : memref<32x64xf32, #tpu.memory_space<vmem>>, vector<32x64xf32>
    %cst = arith.constant dense<0.000000e+00> : vector<32x64xf32>
    %7 = tpu.matmul %5, %6, %cst {dimension_numbers = #tpu.dot_dimension_numbers<[1], [0], [0], [1], [0, 0, 1, 1], [], []>} : vector<32x32xf32>, vector<32x64xf32>, vector<32x64xf32> -> vector<32x64xf32>
    %c0_7 = arith.constant 0 : index
    %c0_8 = arith.constant 0 : index
    %8 = vector.load %arg17[%c0_7, %c0_8] : memref<32x64xf32, #tpu.memory_space<vmem>>, vector<32x64xf32>
    %c0_9 = arith.constant 0 : index
    %c0_10 = arith.constant 0 : index
    %9 = vector.load %arg18[%c0_9, %c0_10] : memref<32x64xf32, #tpu.memory_space<vmem>>, vector<32x64xf32>
    %10 = tpu.iota {dimensions = array<i32: 1>} : vector<1x32xi32>
    %c17_i32 = arith.constant 17 : i32
    %11 = vector.broadcast %c17_i32 : i32 to vector<1x32xi32>
    %12 = arith.cmpi slt, %10, %11 : vector<1x32xi32>
    %13 = vector.extract_strided_slice %7 {offsets = [0, 0], sizes = [32, 16], strides = [1, 1]} : vector<32x64xf32> to vector<32x16xf32>
    %14 = vector.extract_strided_slice %8 {offsets = [0, 0], sizes = [32, 16], strides = [1, 1]} : vector<32x64xf32> to vector<32x16xf32>
    %cst_11 = arith.constant dense<0.000000e+00> : vector<32x32xf32>
    %15 = tpu.matmul %13, %14, %cst_11 {dimension_numbers = #tpu.dot_dimension_numbers<[1], [1], [0], [0], [0, 0, 1, 0], [], []>} : vector<32x16xf32>, vector<32x16xf32>, vector<32x32xf32> -> vector<32x32xf32>
    %cst_12 = arith.constant -1.000000e+30 : f32
    %16 = vector.shape_cast %12 : vector<1x32xi1> to vector<1x32xi1>
    %17 = vector.broadcast %16 : vector<1x32xi1> to vector<32x32xi1>
    %18 = vector.broadcast %cst_12 : f32 to vector<32x32xf32>
    %19 = arith.select %17, %15, %18 : vector<32x32xi1>, vector<32x32xf32>
    %cst_13 = arith.constant dense<0xFF800000> : vector<32xf32>
    %20 = vector.multi_reduction <maximumf>, %19, %cst_13 [1] : vector<32x32xf32> to vector<32xf32>
    %21 = vector.shape_cast %20 : vector<32xf32> to vector<32x1xf32>
    %22 = vector.broadcast %21 : vector<32x1xf32> to vector<32x32xf32>
    %23 = arith.subf %19, %22 : vector<32x32xf32>
    %24 = math.exp %23 : vector<32x32xf32>
    %cst_14 = arith.constant dense<0.000000e+00> : vector<32xf32>
    %25 = vector.multi_reduction <add>, %24, %cst_14 [1] : vector<32x32xf32> to vector<32xf32>
    %26 = vector.shape_cast %25 : vector<32xf32> to vector<32x1xf32>
    %27 = tpu.reciprocal %26 : vector<32x1xf32> -> vector<32x1xf32>
    %28 = vector.broadcast %27 : vector<32x1xf32> to vector<32x32xf32>
    %29 = arith.mulf %24, %28 : vector<32x32xf32>
    %30 = vector.extract_strided_slice %9 {offsets = [0, 0], sizes = [32, 16], strides = [1, 1]} : vector<32x64xf32> to vector<32x16xf32>
    %cst_15 = arith.constant dense<0.000000e+00> : vector<32x16xf32>
    %31 = tpu.matmul %29, %30, %cst_15 {dimension_numbers = #tpu.dot_dimension_numbers<[1], [0], [0], [1], [0, 0, 1, 1], [], []>} : vector<32x32xf32>, vector<32x16xf32>, vector<32x16xf32> -> vector<32x16xf32>
    %32 = vector.extract_strided_slice %7 {offsets = [0, 16], sizes = [32, 16], strides = [1, 1]} : vector<32x64xf32> to vector<32x16xf32>
    %33 = vector.extract_strided_slice %8 {offsets = [0, 16], sizes = [32, 16], strides = [1, 1]} : vector<32x64xf32> to vector<32x16xf32>
    %cst_16 = arith.constant dense<0.000000e+00> : vector<32x32xf32>
    %34 = tpu.matmul %32, %33, %cst_16 {dimension_numbers = #tpu.dot_dimension_numbers<[1], [1], [0], [0], [0, 0, 1, 0], [], []>} : vector<32x16xf32>, vector<32x16xf32>, vector<32x32xf32> -> vector<32x32xf32>
    %cst_17 = arith.constant -1.000000e+30 : f32
    %35 = vector.shape_cast %12 : vector<1x32xi1> to vector<1x32xi1>
    %36 = vector.broadcast %35 : vector<1x32xi1> to vector<32x32xi1>
    %37 = vector.broadcast %cst_17 : f32 to vector<32x32xf32>
    %38 = arith.select %36, %34, %37 : vector<32x32xi1>, vector<32x32xf32>
    %cst_18 = arith.constant dense<0xFF800000> : vector<32xf32>
    %39 = vector.multi_reduction <maximumf>, %38, %cst_18 [1] : vector<32x32xf32> to vector<32xf32>
    %40 = vector.shape_cast %39 : vector<32xf32> to vector<32x1xf32>
    %41 = vector.broadcast %40 : vector<32x1xf32> to vector<32x32xf32>
    %42 = arith.subf %38, %41 : vector<32x32xf32>
    %43 = math.exp %42 : vector<32x32xf32>
    %cst_19 = arith.constant dense<0.000000e+00> : vector<32xf32>
    %44 = vector.multi_reduction <add>, %43, %cst_19 [1] : vector<32x32xf32> to vector<32xf32>
    %45 = vector.shape_cast %44 : vector<32xf32> to vector<32x1xf32>
    %46 = tpu.reciprocal %45 : vector<32x1xf32> -> vector<32x1xf32>
    %47 = vector.broadcast %46 : vector<32x1xf32> to vector<32x32xf32>
    %48 = arith.mulf %43, %47 : vector<32x32xf32>
    %49 = vector.extract_strided_slice %9 {offsets = [0, 16], sizes = [32, 16], strides = [1, 1]} : vector<32x64xf32> to vector<32x16xf32>
    %cst_20 = arith.constant dense<0.000000e+00> : vector<32x16xf32>
    %50 = tpu.matmul %48, %49, %cst_20 {dimension_numbers = #tpu.dot_dimension_numbers<[1], [0], [0], [1], [0, 0, 1, 1], [], []>} : vector<32x32xf32>, vector<32x16xf32>, vector<32x16xf32> -> vector<32x16xf32>
    %51 = vector.extract_strided_slice %7 {offsets = [0, 32], sizes = [32, 16], strides = [1, 1]} : vector<32x64xf32> to vector<32x16xf32>
    %52 = vector.extract_strided_slice %8 {offsets = [0, 32], sizes = [32, 16], strides = [1, 1]} : vector<32x64xf32> to vector<32x16xf32>
    %cst_21 = arith.constant dense<0.000000e+00> : vector<32x32xf32>
    %53 = tpu.matmul %51, %52, %cst_21 {dimension_numbers = #tpu.dot_dimension_numbers<[1], [1], [0], [0], [0, 0, 1, 0], [], []>} : vector<32x16xf32>, vector<32x16xf32>, vector<32x32xf32> -> vector<32x32xf32>
    %cst_22 = arith.constant -1.000000e+30 : f32
    %54 = vector.shape_cast %12 : vector<1x32xi1> to vector<1x32xi1>
    %55 = vector.broadcast %54 : vector<1x32xi1> to vector<32x32xi1>
    %56 = vector.broadcast %cst_22 : f32 to vector<32x32xf32>
    %57 = arith.select %55, %53, %56 : vector<32x32xi1>, vector<32x32xf32>
    %cst_23 = arith.constant dense<0xFF800000> : vector<32xf32>
    %58 = vector.multi_reduction <maximumf>, %57, %cst_23 [1] : vector<32x32xf32> to vector<32xf32>
    %59 = vector.shape_cast %58 : vector<32xf32> to vector<32x1xf32>
    %60 = vector.broadcast %59 : vector<32x1xf32> to vector<32x32xf32>
    %61 = arith.subf %57, %60 : vector<32x32xf32>
    %62 = math.exp %61 : vector<32x32xf32>
    %cst_24 = arith.constant dense<0.000000e+00> : vector<32xf32>
    %63 = vector.multi_reduction <add>, %62, %cst_24 [1] : vector<32x32xf32> to vector<32xf32>
    %64 = vector.shape_cast %63 : vector<32xf32> to vector<32x1xf32>
    %65 = tpu.reciprocal %64 : vector<32x1xf32> -> vector<32x1xf32>
    %66 = vector.broadcast %65 : vector<32x1xf32> to vector<32x32xf32>
    %67 = arith.mulf %62, %66 : vector<32x32xf32>
    %68 = vector.extract_strided_slice %9 {offsets = [0, 32], sizes = [32, 16], strides = [1, 1]} : vector<32x64xf32> to vector<32x16xf32>
    %cst_25 = arith.constant dense<0.000000e+00> : vector<32x16xf32>
    %69 = tpu.matmul %67, %68, %cst_25 {dimension_numbers = #tpu.dot_dimension_numbers<[1], [0], [0], [1], [0, 0, 1, 1], [], []>} : vector<32x32xf32>, vector<32x16xf32>, vector<32x16xf32> -> vector<32x16xf32>
    %70 = vector.extract_strided_slice %7 {offsets = [0, 48], sizes = [32, 16], strides = [1, 1]} : vector<32x64xf32> to vector<32x16xf32>
    %71 = vector.extract_strided_slice %8 {offsets = [0, 48], sizes = [32, 16], strides = [1, 1]} : vector<32x64xf32> to vector<32x16xf32>
    %cst_26 = arith.constant dense<0.000000e+00> : vector<32x32xf32>
    %72 = tpu.matmul %70, %71, %cst_26 {dimension_numbers = #tpu.dot_dimension_numbers<[1], [1], [0], [0], [0, 0, 1, 0], [], []>} : vector<32x16xf32>, vector<32x16xf32>, vector<32x32xf32> -> vector<32x32xf32>
    %cst_27 = arith.constant -1.000000e+30 : f32
    %73 = vector.shape_cast %12 : vector<1x32xi1> to vector<1x32xi1>
    %74 = vector.broadcast %73 : vector<1x32xi1> to vector<32x32xi1>
    %75 = vector.broadcast %cst_27 : f32 to vector<32x32xf32>
    %76 = arith.select %74, %72, %75 : vector<32x32xi1>, vector<32x32xf32>
    %cst_28 = arith.constant dense<0xFF800000> : vector<32xf32>
    %77 = vector.multi_reduction <maximumf>, %76, %cst_28 [1] : vector<32x32xf32> to vector<32xf32>
    %78 = vector.shape_cast %77 : vector<32xf32> to vector<32x1xf32>
    %79 = vector.broadcast %78 : vector<32x1xf32> to vector<32x32xf32>
    %80 = arith.subf %76, %79 : vector<32x32xf32>
    %81 = math.exp %80 : vector<32x32xf32>
    %cst_29 = arith.constant dense<0.000000e+00> : vector<32xf32>
    %82 = vector.multi_reduction <add>, %81, %cst_29 [1] : vector<32x32xf32> to vector<32xf32>
    %83 = vector.shape_cast %82 : vector<32xf32> to vector<32x1xf32>
    %84 = tpu.reciprocal %83 : vector<32x1xf32> -> vector<32x1xf32>
    %85 = vector.broadcast %84 : vector<32x1xf32> to vector<32x32xf32>
    %86 = arith.mulf %81, %85 : vector<32x32xf32>
    %87 = vector.extract_strided_slice %9 {offsets = [0, 48], sizes = [32, 16], strides = [1, 1]} : vector<32x64xf32> to vector<32x16xf32>
    %cst_30 = arith.constant dense<0.000000e+00> : vector<32x16xf32>
    %88 = tpu.matmul %86, %87, %cst_30 {dimension_numbers = #tpu.dot_dimension_numbers<[1], [0], [0], [1], [0, 0, 1, 1], [], []>} : vector<32x32xf32>, vector<32x16xf32>, vector<32x16xf32> -> vector<32x16xf32>
    %89 = tpu.concatenate %31, %50, %69, %88 in 1 : vector<32x16xf32>, vector<32x16xf32>, vector<32x16xf32>, vector<32x16xf32> -> vector<32x64xf32>
    %c0_31 = arith.constant 0 : index
    %c0_32 = arith.constant 0 : index
    %90 = vector.load %arg8[%c0_31, %c0_32] : memref<1x32xf32, #tpu.memory_space<vmem>>, vector<1x32xf32>
    %91 = vector.shape_cast %90 : vector<1x32xf32> to vector<32xf32>
    %92 = vector.shape_cast %91 : vector<32xf32> to vector<1x32xf32>
    %93 = vector.broadcast %92 : vector<1x32xf32> to vector<32x32xf32>
    %94 = arith.addf %4, %93 : vector<32x32xf32>
    %c0_33 = arith.constant 0 : index
    %c0_34 = arith.constant 0 : index
    %95 = vector.load %arg7[%c0_33, %c0_34] : memref<64x32xf32, #tpu.memory_space<vmem>>, vector<64x32xf32>
    %cst_35 = arith.constant dense<0.000000e+00> : vector<32x32xf32>
    %96 = tpu.matmul %89, %95, %cst_35 {dimension_numbers = #tpu.dot_dimension_numbers<[1], [0], [0], [1], [0, 0, 1, 1], [], []>} : vector<32x64xf32>, vector<64x32xf32>, vector<32x32xf32> -> vector<32x32xf32>
    %97 = arith.addf %94, %96 : vector<32x32xf32>
    %c0_36 = arith.constant 0 : index
    %c0_37 = arith.constant 0 : index
    %98 = vector.load %arg9[%c0_36, %c0_37] : memref<1x32xf32, #tpu.memory_space<vmem>>, vector<1x32xf32>
    %99 = vector.shape_cast %98 : vector<1x32xf32> to vector<32xf32>
    %c0_38 = arith.constant 0 : index
    %c0_39 = arith.constant 0 : index
    %100 = vector.load %arg10[%c0_38, %c0_39] : memref<1x32xf32, #tpu.memory_space<vmem>>, vector<1x32xf32>
    %101 = vector.shape_cast %100 : vector<1x32xf32> to vector<32xf32>
    %cst_40 = arith.constant dense<0.000000e+00> : vector<32xf32>
    %102 = vector.multi_reduction <add>, %97, %cst_40 [1] : vector<32x32xf32> to vector<32xf32>
    %103 = vector.shape_cast %102 : vector<32xf32> to vector<32x1xf32>
    %cst_41 = arith.constant 3.200000e+01 : f32
    %104 = vector.broadcast %cst_41 : f32 to vector<32x1xf32>
    %105 = arith.divf %103, %104 : vector<32x1xf32>
    %106 = vector.broadcast %105 : vector<32x1xf32> to vector<32x32xf32>
    %107 = arith.subf %97, %106 : vector<32x32xf32>
    %108 = vector.broadcast %105 : vector<32x1xf32> to vector<32x32xf32>
    %109 = arith.subf %97, %108 : vector<32x32xf32>
    %110 = arith.mulf %107, %109 : vector<32x32xf32>
    %cst_42 = arith.constant dense<0.000000e+00> : vector<32xf32>
    %111 = vector.multi_reduction <add>, %110, %cst_42 [1] : vector<32x32xf32> to vector<32xf32>
    %112 = vector.shape_cast %111 : vector<32xf32> to vector<32x1xf32>
    %cst_43 = arith.constant 3.200000e+01 : f32
    %113 = vector.broadcast %cst_43 : f32 to vector<32x1xf32>
    %114 = arith.divf %112, %113 : vector<32x1xf32>
    %115 = vector.broadcast %105 : vector<32x1xf32> to vector<32x32xf32>
    %116 = arith.subf %97, %115 : vector<32x32xf32>
    %cst_44 = arith.constant 9.99999974E-6 : f32
    %117 = vector.broadcast %cst_44 : f32 to vector<32x1xf32>
    %118 = arith.addf %114, %117 : vector<32x1xf32>
    %119 = math.rsqrt %118 : vector<32x1xf32>
    %120 = vector.broadcast %119 : vector<32x1xf32> to vector<32x32xf32>
    %121 = arith.mulf %116, %120 : vector<32x32xf32>
    %122 = vector.shape_cast %99 : vector<32xf32> to vector<1x32xf32>
    %123 = vector.broadcast %122 : vector<1x32xf32> to vector<32x32xf32>
    %124 = arith.mulf %121, %123 : vector<32x32xf32>
    %125 = vector.shape_cast %101 : vector<32xf32> to vector<1x32xf32>
    %126 = vector.broadcast %125 : vector<1x32xf32> to vector<32x32xf32>
    %127 = arith.addf %124, %126 : vector<32x32xf32>
    %c0_45 = arith.constant 0 : index
    %c0_46 = arith.constant 0 : index
    %128 = vector.load %arg11[%c0_45, %c0_46] : memref<32x64xf32, #tpu.memory_space<vmem>>, vector<32x64xf32>
    %cst_47 = arith.constant dense<0.000000e+00> : vector<32x64xf32>
    %129 = tpu.matmul %127, %128, %cst_47 {dimension_numbers = #tpu.dot_dimension_numbers<[1], [0], [0], [1], [0, 0, 1, 1], [], []>} : vector<32x32xf32>, vector<32x64xf32>, vector<32x64xf32> -> vector<32x64xf32>
    %c0_48 = arith.constant 0 : index
    %c0_49 = arith.constant 0 : index
    %130 = vector.load %arg12[%c0_48, %c0_49] : memref<1x64xf32, #tpu.memory_space<vmem>>, vector<1x64xf32>
    %131 = vector.shape_cast %130 : vector<1x64xf32> to vector<64xf32>
    %132 = vector.shape_cast %131 : vector<64xf32> to vector<1x64xf32>
    %133 = vector.broadcast %132 : vector<1x64xf32> to vector<32x64xf32>
    %134 = arith.addf %129, %133 : vector<32x64xf32>
    %cst_50 = arith.constant 5.000000e-01 : f32
    %135 = vector.broadcast %cst_50 : f32 to vector<32x64xf32>
    %136 = arith.mulf %135, %134 : vector<32x64xf32>
    %cst_51 = arith.constant 4.471500e-02 : f32
    %137 = vector.broadcast %cst_51 : f32 to vector<32x64xf32>
    %138 = arith.mulf %137, %134 : vector<32x64xf32>
    %139 = arith.mulf %138, %134 : vector<32x64xf32>
    %140 = arith.mulf %139, %134 : vector<32x64xf32>
    %141 = arith.addf %134, %140 : vector<32x64xf32>
    %cst_52 = arith.constant 0.797884583 : f32
    %142 = vector.broadcast %cst_52 : f32 to vector<32x64xf32>
    %143 = arith.mulf %142, %141 : vector<32x64xf32>
    %144 = math.tanh %143 : vector<32x64xf32>
    %cst_53 = arith.constant 1.000000e+00 : f32
    %145 = vector.broadcast %cst_53 : f32 to vector<32x64xf32>
    %146 = arith.addf %145, %144 : vector<32x64xf32>
    %147 = arith.mulf %136, %146 : vector<32x64xf32>
    %c0_54 = arith.constant 0 : index
    %c0_55 = arith.constant 0 : index
    %148 = vector.load %arg14[%c0_54, %c0_55] : memref<1x32xf32, #tpu.memory_space<vmem>>, vector<1x32xf32>
    %149 = vector.shape_cast %148 : vector<1x32xf32> to vector<32xf32>
    %150 = vector.shape_cast %149 : vector<32xf32> to vector<1x32xf32>
    %151 = vector.broadcast %150 : vector<1x32xf32> to vector<32x32xf32>
    %152 = arith.addf %97, %151 : vector<32x32xf32>
    %c0_56 = arith.constant 0 : index
    %c0_57 = arith.constant 0 : index
    %153 = vector.load %arg13[%c0_56, %c0_57] : memref<64x32xf32, #tpu.memory_space<vmem>>, vector<64x32xf32>
    %cst_58 = arith.constant dense<0.000000e+00> : vector<32x32xf32>
    %154 = tpu.matmul %147, %153, %cst_58 {dimension_numbers = #tpu.dot_dimension_numbers<[1], [0], [0], [1], [0, 0, 1, 1], [], []>} : vector<32x64xf32>, vector<64x32xf32>, vector<32x32xf32> -> vector<32x32xf32>
    %155 = arith.addf %152, %154 : vector<32x32xf32>
    %c0_59 = arith.constant 0 : index
    %c0_60 = arith.constant 0 : index
    %c0_61 = arith.constant 0 : index
    %156 = vector.load %arg15[%c0_59, %c0_60, %c0_61] : memref<1x32x32xf32, #tpu.memory_space<vmem>>, vector<1x32x32xf32>
    %157 = vector.shape_cast %156 : vector<1x32x32xf32> to vector<32x32xf32>
    %158 = vector.shape_cast %155 : vector<32x32xf32> to vector<1x32x32xf32>
    tpu.vector_store %arg15[%c0_59, %c0_60, %c0_61], %158 {strides = array<i32>} : memref<1x32x32xf32, #tpu.memory_space<vmem>>, vector<1x32x32xf32>,
    return
  }
  func.func @transform_0(%arg0: i32, %arg1: i32) -> (i32, i32, i32) {
    %c0_i32 = arith.constant 0 : i32
    %c0_i32_0 = arith.constant 0 : i32
    %c0_i32_1 = arith.constant 0 : i32
    return %arg0, %c0_i32, %c0_i32_0 : i32, i32, i32
  }
  func.func @transform_1(%arg0: i32, %arg1: i32) -> (i32, i32) {
    %c0_i32 = arith.constant 0 : i32
    %c0_i32_0 = arith.constant 0 : i32
    %c0_i32_1 = arith.constant 0 : i32
    return %c0_i32, %c0_i32_0 : i32, i32
  }
  func.func @transform_2(%arg0: i32, %arg1: i32) -> (i32, i32) {
    %c0_i32 = arith.constant 0 : i32
    %c0_i32_0 = arith.constant 0 : i32
    %c0_i32_1 = arith.constant 0 : i32
    return %c0_i32, %c0_i32_0 : i32, i32
  }
  func.func @transform_3(%arg0: i32, %arg1: i32) -> (i32, i32) {
    %c0_i32 = arith.constant 0 : i32
    %c0_i32_0 = arith.constant 0 : i32
    %c0_i32_1 = arith.constant 0 : i32
    return %c0_i32, %c0_i32_0 : i32, i32
  }
  func.func @transform_4(%arg0: i32, %arg1: i32) -> (i32, i32) {
    %c0_i32 = arith.constant 0 : i32
    %c0_i32_0 = arith.constant 0 : i32
    %c0_i32_1 = arith.constant 0 : i32
    return %c0_i32, %c0_i32_0 : i32, i32
  }
  func.func @transform_5(%arg0: i32, %arg1: i32) -> (i32, i32) {
    %c0_i32 = arith.constant 0 : i32
    %c0_i32_0 = arith.constant 0 : i32
    %c0_i32_1 = arith.constant 0 : i32
    return %c0_i32, %c0_i32_0 : i32, i32
  }
  func.func @transform_6(%arg0: i32, %arg1: i32) -> (i32, i32) {
    %c0_i32 = arith.constant 0 : i32
    %c0_i32_0 = arith.constant 0 : i32
    %c0_i32_1 = arith.constant 0 : i32
    return %c0_i32, %c0_i32_0 : i32, i32
  }
  func.func @transform_7(%arg0: i32, %arg1: i32) -> (i32, i32) {
    %c0_i32 = arith.constant 0 : i32
    %c0_i32_0 = arith.constant 0 : i32
    %c0_i32_1 = arith.constant 0 : i32
    return %c0_i32, %c0_i32_0 : i32, i32
  }
  func.func @transform_8(%arg0: i32, %arg1: i32) -> (i32, i32) {
    %c0_i32 = arith.constant 0 : i32
    %c0_i32_0 = arith.constant 0 : i32
    %c0_i32_1 = arith.constant 0 : i32
    return %c0_i32, %c0_i32_0 : i32, i32
  }
  func.func @transform_9(%arg0: i32, %arg1: i32) -> (i32, i32) {
    %c0_i32 = arith.constant 0 : i32
    %c0_i32_0 = arith.constant 0 : i32
    %c0_i32_1 = arith.constant 0 : i32
    return %c0_i32, %c0_i32_0 : i32, i32
  }
  func.func @transform_10(%arg0: i32, %arg1: i32) -> (i32, i32) {
    %c0_i32 = arith.constant 0 : i32
    %c0_i32_0 = arith.constant 0 : i32
    %c0_i32_1 = arith.constant 0 : i32
    return %c0_i32, %c0_i32_0 : i32, i32
  }
  func.func @transform_11(%arg0: i32, %arg1: i32) -> (i32, i32) {
    %c0_i32 = arith.constant 0 : i32
    %c0_i32_0 = arith.constant 0 : i32
    %c0_i32_1 = arith.constant 0 : i32
    return %c0_i32, %c0_i32_0 : i32, i32
  }
  func.func @transform_12(%arg0: i32, %arg1: i32) -> (i32, i32) {
    %c0_i32 = arith.constant 0 : i32
    %c0_i32_0 = arith.constant 0 : i32
    %c0_i32_1 = arith.constant 0 : i32
    return %c0_i32, %c0_i32_0 : i32, i32
  }
  func.func @transform_13(%arg0: i32, %arg1: i32) -> (i32, i32, i32) {
    %c0_i32 = arith.constant 0 : i32
    %c0_i32_0 = arith.constant 0 : i32
    return %arg0, %arg1, %c0_i32 : i32, i32, i32
  }
}

</mosaic_0001>

<bundles_post_ra>
// kernel: tpu_custom_call.1
= control target key start
LH: loop header
LB: loop body
LE: loop exit
PB: predicated region body
PF: predicated region fallthrough
CT: control target
= control target key end

     0   :  { %s3877_s0 = inlined_call_operand.vmem [shape: f32[2,32,32], index: 0, kind: input, shape index: {}]   ;;  %s3878_s1 = inlined_call_operand.hbm [shape: f32[1,32], index: 1, kind: input, shape index: {}]   ;;  %s3879_s2 = inlined_call_operand.vmem [shape: f32[1,32], index: 2, kind: input, shape index: {}]   ;;  %s3880_s3 = inlined_call_operand.vmem [shape: f32[32,64], index: 3, kind: input, shape index: {}]   ;;  %s3881_s4 = inlined_call_operand.vmem [shape: f32[32,128], index: 4, kind: input, shape index: {}]   ;;  %s3882_s5 = inlined_call_operand.vmem [shape: f32[64,32], index: 5, kind: input, shape index: {}]   ;;  %s3883_s6 = inlined_call_operand.vmem [shape: f32[1,32], index: 6, kind: input, shape index: {}]   ;;  %s3884_s7 = inlined_call_operand.vmem [shape: f32[1,32], index: 7, kind: input, shape index: {}]   ;;  %s3885_s8 = inlined_call_operand.vmem [shape: f32[1,32], index: 8, kind: input, shape index: {}]   ;;  %s3886_s9 = inlined_call_operand.vmem [shape: f32[32,64], index: 9, kind: input, shape index: {}]   ;;  %s3887_s10 = inlined_call_operand.vmem [shape: f32[1,64], index: 10, kind: input, shape index: {}]   ;;  %s3888_s11 = inlined_call_operand.vmem [shape: f32[64,32], index: 11, kind: input, shape index: {}]   ;;  %s3889_s12 = inlined_call_operand.vmem [shape: f32[1,32], index: 12, kind: input, shape index: {}]   ;;  %s3890_s13 = inlined_call_operand.hbm [shape: f32[2,32,32], index: 13, kind: output, shape index: {}]  }
   0x1   :  { %3893 = sst [smem:[#allocation14_spill]] %s3877_s0 }
   0x2   :  { %18 = vsyncpa [#allocation6], 0 }
   0x3   :  { %19 = vsyncpa [#allocation7], 0 }
   0x4   :  { %21 = vsyncpa [#allocation7 + $0x1], 0  ;;  %s3265_s25 = smov 0   ;;  %s3267_s26 = smov 0  }
   0x5   :  { %s3269_s27 = smov 0   ;;  %s3271_s28 = smov 0  }
   0x6   :  { %s3273_s29 = smov 0   ;;  %s3275_s30 = smov 0  }
   0x7 LB: > { %3894 = sst [smem:[#allocation11_spill]] %s3178_s29  ;;  %s2511_s14 = sadd.s32 4294967295, %s3182_s30   ;;  %s3182_s30 = sphi %s3275_s30, %s27_s30   ;;  %s3178_s29 = sphi %s3273_s29, %s3904_s29   ;;  %s3174_s28 = sphi %s3271_s28, %s3903_s28   ;;  %s3170_s27 = sphi %s3269_s27, %s3907_s27   ;;  %s3166_s26 = sphi %s3267_s26, %s3906_s26   ;;  %s3162_s25 = sphi %s3265_s25, %s3905_s25  }
   0x8   : > { %s2512_s15 = sadd.s32 4294967294, %s3182_s30   ;;  %s39_s16 = sadd.s32 1, %s3178_s29 }
   0x9   : > { %s326_s17 = sadd.s32 1, %s3170_s27  ;;  %p41_p0 = scmp.ge.s32.totalorder %s39_s16, 2 }
   0xa   : > { %p336_p1 = scmp.ne.s32.totalorder %s3170_s27, %s3166_s26  ;;  %p337_p2 = scmp.eq.s32.totalorder %s2511_s14, 1 }
   0xb   : > { %p342_p3 = scmp.ne.s32.totalorder %s3166_s26, %s3162_s25  ;;  %s3909_s16 = smov (%p41_p0, %s39_s16), 0 }
   0xc   : > { %3895 = sst [smem:[#allocation12_spill]] %s3909_s16  ;;  %p3305_p4 = por %p337_p2, %p336_p1 }
   0xd   : > { %p343_p5 = scmp.eq.s32.totalorder %s2512_s15, 1  ;;  %s321_s19 = ssub.s32 %s3178_s29, %s3909_s16 }
   0xe   : > { %p2513_p6 = scmp.ge.s32.totalorder %s3182_s30, 1  ;;  %p324_p7 = scmp.eq.s32.totalorder %s321_s19, 0 }
   0xf   : > { %p3312_p8 = por %p343_p5, %p342_p3  ;;  %p350_p9 = scmp.lt.s32.totalorder %s3182_s30, 3 }
  0x10   : > { %s3318_s21 = scalar_select %p324_p7, %s3170_s27, %s326_s17  }
  0x11   : > { %p3320_p10 = pnand %p2513_p6, %p350_p9  ;;  %p3324_p11 = scmp.eq.s32.totalorder %s2511_s14, 0 }
  0x12   : > { %3898 = sst [smem:[#allocation13_spill]] %s3318_s21  ;;  %s3184_s24 = smov [#allocation5]  }
  0x13   : > { %p2919_p12 = pneg %p3320_p10  ;;  %s363_s15 = sshll.u32 %s3184_s24, 4  ;;  %s364_s15 = int_to_ptr.vmem [resolvable:$true] %s363_s15 }
  0x14   : > { %s3087_s17 = scalar_lea.vmem %s364_s15, 16  ;;  %s3094_s19 = scalar_lea.vmem %s364_s15, 32 }
  0x15   : > { %p2920_p13 = pnand %p3324_p11, %p2919_p12  ;;  %p3088_p1 = scmp.ne.s32.totalorder %s364_s15, %s3087_s17 }
  0x16   : > { %p3095_p5 = scmp.lt.s32.totalorder %s364_s15, %s364_s15  ;;  %p3096_p6 = scmp.lt.s32.totalorder %s3094_s19, %s3087_s17 }
  0x17   : > { %p3078_p0 = pneg %p2920_p13 }
  0x18   : > { %p3097_p7 = por %p3096_p6, %p3095_p5 }
  0x19   : > { %p3090_p2 = pnand %p3088_p1, %p3078_p0 }
  0x1b   : > { %p3091_p3 = pneg %p3090_p2 }
  0x1d   : > { %p3098_p9 = pnand %p3097_p7, %p3091_p3 }
  0x1f   : > { %3101 = shalt.err (!%p3098_p9)
}
  0x20   : > { %2922 = dma.hbm_to_vmem [thread:$0]  (!%p2920_p13), %s3878_s1, 16, %s364_s15, [#allocation6]  }
  0x21   : > { %417 = sbr.rel (%p3320_p10) target bundleno = 4013 (0xfad), region = 72 }
  0x26   : > { %3153 = dma.done.wait (%p3324_p11), [#allocation6], 16  }
  0x27   : > { %3155 = vsyncadd (%p3324_p11), [#allocation6], 4294967280  ;;  %p461_p12 = scmp.lt.s32.totalorder %s3174_s28, 1  ;;  %s3901_s0 = sld [smem:[#allocation14_spill]]  ;;  %vm477_vm0 = vcmask 261120   ;;  %v558_v28 = vld [vmem:[%s3881_s4 + $0x18] sm:$0xff] }
  0x28   : > { %v557_v29 = vld [vmem:[%s3881_s4 + $0x10] sm:$0xff]  ;;  %2715 = vmatprep.subr.mxu0 %v558_v28  ;;  %v556_v30 = vld [vmem:[%s3881_s4 + $0x8] sm:$0xff]  ;;  %v555_v31 = vld [vmem:[%s3881_s4] sm:$0xff]  ;;  %vm656_vm1 = vcmask 523264   ;;  %vm802_vm2 = vcmask 130048   ;;  %s3185_s29 = smov 64  }
  0x29   : > { %s462_s24 = scalar_select %p461_p12, %s3174_s28, 1  ;;  %2716 = vmatpush3.msra.mxu0 %v558_v28  ;;  %v692_v32 = vld [vmem:[%s3880_s3 + $0x18] sm:$0xff]  ;;  %v691_v33 = vld [vmem:[%s3880_s3 + $0x10] sm:$0xff]  ;;  %v690_v34 = vld [vmem:[%s3880_s3 + $0x8] sm:$0xff]  ;;  %vm1941_vm4 = vcmask 392192  }
  0x2a   : > { %2717 = vmatprep.subr.mxu0 %v557_v29  ;;  %2729 = vmatprep.subr.mxu1 %v692_v32  ;;  %v689_v35 = vld [vmem:[%s3880_s3] sm:$0xff]  ;;  %s3186_s16 = smov 112   ;;  %s3187_s22 = smov 96  }
  0x2b   : > { %s2601_s17 = sshll.u32 %s462_s24, 5  ;;  %2718 = vmatpush3.msra.mxu0 %v557_v29  ;;  %2730 = vmatpush3.msra.mxu1 %v692_v32  ;;  %v2521_v49 = vld [vmem:[#allocation5] ss:$0 sm:$0xff]  ;;  %s3188_s23 = smov 80  }
  0x2c   : > { %2719 = vmatprep.subr.mxu0 %v556_v30  ;;  %2731 = vmatprep.subr.mxu1 %v691_v33  ;;  %v2522_v51 = vld [vmem:[%s3879_s2] ss:$0 sm:$0xff]  ;;  %s3189_s15 = smov 16   ;;  %s3190_s14 = smov 32  }
  0x2d   : > { %s3346_s21 = scalar_lea.vmem %s3901_s0, %s2601_s17  ;;  %2720 = vmatpush3.msra.mxu0 %v556_v30  ;;  %2732 = vmatpush3.msra.mxu1 %v691_v33  ;;  %s3192_s19 = smov [#allocation8]  }
  0x2e   : > { %v471_v0 = vld [vmem:[%s3346_s21] sm:$0xff]  ;;  %v473_v1 = vld [vmem:[%s3346_s21 + $0x10] sm:$0xff]  ;;  %v472_v2 = vld [vmem:[%s3346_s21 + $0x8] sm:$0xff]  ;;  %2721 = vmatprep.subr.mxu0 %v555_v31  ;;  %2733 = vmatprep.subr.mxu1 %v690_v34 }
  0x2f   : > { %v478_v3 = vsel %vm477_vm0, %v471_v0, 0.0  ;;  %v484_v4 = vsel %vm477_vm0, %v473_v1, 0.0  ;;  %v474_v5 = vld [vmem:[%s3346_s21 + $0x18] sm:$0xff]  ;;  %v481_v6 = vsel %vm477_vm0, %v472_v2, 0.0  ;;  %2722 = vmatpush3.msra.mxu0 %v555_v31  ;;  %2734 = vmatpush3.msra.mxu1 %v690_v34 }
  0x30   : > { %479 = vadd.xlane.f32.xlu0 %v478_v3  ;;  %485 = vadd.xlane.f32.xlu1 %v484_v4  ;;  %v487_v7 = vsel %vm477_vm0, %v474_v5, 0.0 }
  0x31   : > { %2735 = vmatprep.subr.mxu1 %v689_v35 }
  0x32   : > { %2736 = vmatpush3.msra.mxu1 %v689_v35 }
  0x34   : > { %482 = vadd.xlane.f32.xlu0 %v481_v6  ;;  %488 = vadd.xlane.f32.xlu1 %v487_v7 }
  0xb9   : > { %v480_v8 = vpop.xlane.xlu0 %479  ;;  %v486_v9 = vpop.xlane.xlu1 %485 }
  0xba   : > { %v491_v10 = vmul.f32 0.03125, %v480_v8  ;;  %v493_v11 = vmul.f32 0.03125, %v486_v9 }
  0xbc   : > { %v495_v12 = vsub.f32 %v471_v0, %v491_v10  ;;  %v3356_v13 = vsub.f32 %v473_v1, %v493_v11 }
  0xbd   : > { %v483_v14 = vpop.xlane.xlu0 %482  ;;  %v489_v15 = vpop.xlane.xlu1 %488 }
  0xbe   : > { %v492_v16 = vmul.f32 0.03125, %v483_v14  ;;  %v494_v17 = vmul.f32 0.03125, %v489_v15  ;;  %v499_v18 = vmul.f32 %v495_v12, %v495_v12  ;;  %v501_v19 = vmul.f32 %v3356_v13, %v3356_v13 }
  0xc0   : > { %v496_v20 = vsub.f32 %v472_v2, %v492_v16  ;;  %v3360_v21 = vsub.f32 %v474_v5, %v494_v17  ;;  %v503_v22 = vsel %vm477_vm0, %v499_v18, 0.0  ;;  %v509_v23 = vsel %vm477_vm0, %v501_v19, 0.0 }
  0xc1   : > { %504 = vadd.xlane.f32.xlu0 %v503_v22  ;;  %v799_v18 = vlaneseq }
  0xc2   : > { %v500_v24 = vmul.f32 %v496_v20, %v496_v20  ;;  %v502_v25 = vmul.f32 %v3360_v21, %v3360_v21 }
  0xc3   : > { %v3453_v19 = vand.u32 127, %v799_v18 }
  0xc4   : > { %v506_v26 = vsel %vm477_vm0, %v500_v24, 0.0  ;;  %v512_v27 = vsel %vm477_vm0, %v502_v25, 0.0 }
  0xc5   : > { %510 = vadd.xlane.f32.xlu0 %v509_v23  ;;  %507 = vadd.xlane.f32.xlu1 %v506_v26  ;;  %vm801_vm3 = vcmp.lt.s32.totalorder %v3453_v19, 17 }
  0xc9   : > { %513 = vadd.xlane.f32.xlu1 %v512_v27 }
 0x14a   : > { %v505_v36 = vpop.xlane.xlu0 %504 }
 0x14b   : > { %v515_v37 = vmul.f32 0.03125, %v505_v36 }
 0x14d   : > { %v519_v38 = vadd.f32 1e-05, %v515_v37 }
 0x14e   : > { %v508_v39 = vpop.xlane.xlu1 %507  ;;  %v511_v40 = vpop.xlane.xlu0 %510 }
 0x14f   : > { %2988 = vrsqrt.f32 %v519_v38  ;;  %v516_v41 = vmul.f32 0.03125, %v508_v39  ;;  %v517_v42 = vmul.f32 0.03125, %v511_v40 }
 0x151   : > { %v520_v43 = vadd.f32 1e-05, %v516_v41  ;;  %v521_v44 = vadd.f32 1e-05, %v517_v42 }
 0x152   : > { %v514_v45 = vpop.xlane.xlu1 %513 }
 0x153   : > { %2990 = vrsqrt.f32 %v520_v43  ;;  %v518_v46 = vmul.f32 0.03125, %v514_v45 }
 0x154   : > { %2992 = vrsqrt.f32 %v521_v44 }
 0x155   : > { %v522_v47 = vadd.f32 1e-05, %v518_v46 }
 0x157   : > { %2994 = vrsqrt.f32 %v522_v47 }
 0x15c   : > { %v2989_v48 = vpop.eup %2988 }
 0x15d   : > { %v527_v50 = vmul.f32 %v2989_v48, %v495_v12 }
 0x15f   : > { %v537_v52 = vmul.f32 %v2521_v49, %v527_v50 }
 0x160   : > { %v2991_v53 = vpop.eup %2990 }
 0x161   : > { %v2993_v54 = vpop.eup %2992  ;;  %v547_v55 = vadd.f32 %v2522_v51, %v537_v52  ;;  %v528_v56 = vmul.f32 %v2991_v53, %v496_v20 }
 0x162   : > { %v529_v57 = vmul.f32 %v2993_v54, %v3356_v13 }
 0x163   : > { %551 = vst.msk [vmem:[#allocation2] sm:$0xff] %vm477_vm0, %v547_v55  ;;  %2723 = vmatprep.mubr.msk.f32.mxu0 %vm477_vm0, %v547_v55  ;;  %v538_v58 = vmul.f32 %v2521_v49, %v528_v56 }
 0x164   : > { %v2995_v59 = vpop.eup %2994  ;;  %v539_v60 = vmul.f32 %v2521_v49, %v529_v57 }
 0x165   : > { %v548_v61 = vadd.f32 %v2522_v51, %v538_v58  ;;  %v530_v62 = vmul.f32 %v2995_v59, %v3360_v21 }
 0x166   : > { %v549_v63 = vadd.f32 %v2522_v51, %v539_v60 }
 0x167   : > { %552 = vst.msk [vmem:[#allocation2 + $0x8] sm:$0xff] %vm477_vm0, %v548_v61  ;;  %2724 = vmatmul.mubr.msk.f32.vlgmr.msra.gmra.mxu0 %vm477_vm0, %v548_v61  ;;  %v540_v0 = vmul.f32 %v2521_v49, %v530_v62 }
 0x168   : > { %553 = vst.msk [vmem:[#allocation2 + $0x10] sm:$0xff] %vm477_vm0, %v549_v63  ;;  %2726 = vmatprep.mubr.msk.f32.mxu0 %vm477_vm0, %v549_v63 }
 0x169   : > { %v550_v1 = vadd.f32 %v2522_v51, %v540_v0 }
 0x16a   : > { %v685_v2 = vld [vmem:[#allocation2] sm:$0xff] }
 0x16b   : > { %554 = vst.msk [vmem:[#allocation2 + $0x18] sm:$0xff] %vm477_vm0, %v550_v1  ;;  %2727 = vmatmul.mubr.msk.f32.gmra.mxu0 %vm477_vm0, %v550_v1  ;;  %2737 = vmatprep.mubr.msk.f32.mxu1 %vm477_vm0, %v685_v2 }
 0x16e   : > { %v686_v3 = vld [vmem:[#allocation2 + $0x8] sm:$0xff] }
 0x16f   : > { %2738 = vmatmul.mubr.msk.f32.vlgmr.msra.gmra.mxu1 %vm477_vm0, %v686_v3  ;;  %v687_v4 = vld [vmem:[#allocation2 + $0x10] sm:$0xff] }
 0x170   : > { %2740 = vmatprep.mubr.msk.f32.mxu1 %vm477_vm0, %v687_v4 }
 0x172   : > { %v688_v5 = vld [vmem:[#allocation2 + $0x18] sm:$0xff] }
 0x173   : > { %2741 = vmatmul.mubr.msk.f32.gmra.mxu1 %vm477_vm0, %v688_v5 }
 0x227   : > { %v2725_v6 = vpop.f32.mrf.mxu0 }
 0x228   : > { %658 = vst.msk [vmem:[#allocation3 + $0x8] sm:$0xff] %vm656_vm1, %v2725_v6 }
 0x229   : > { %v637_v7 = vpop.f32.mrf.mxu0 }
 0x22a   : > { %657 = vst.msk [vmem:[#allocation3] sm:$0xff] %vm656_vm1, %v637_v7 }
 0x22b   : > { %v2728_v8 = vpop.f32.mrf.mxu0 }
 0x22c   : > { %660 = vst.msk [vmem:[#allocation3 + $0x18] sm:$0xff] %vm656_vm1, %v2728_v8 }
 0x22d   : > { %v647_v9 = vpop.f32.mrf.mxu0 }
 0x22e   : > { %659 = vst.msk [vmem:[#allocation3 + $0x10] sm:$0xff] %vm656_vm1, %v647_v9 }
 0x22f   : > { %v3413_v10 = vpop.f32.mrf.mxu1  ;;  %v3431_v14 = vld [vmem:[#allocation3 + $0x8] sm:$0xff] }
 0x231   : > { %v3415_v11 = vpop.f32.mrf.mxu1  ;;  %v3437_v15 = vld [vmem:[#allocation3] sm:$0xff] }
 0x232   : > { %2751 = vmatprep.mubr.msk.f32.mxu0 %vm802_vm2, %v3415_v11 }
 0x233   : > { %v3419_v12 = vld [vmem:[#allocation3 + $0x18] sm:$0xff]  ;;  %v3441_v16 = vpop.f32.mrf.mxu1 }
 0x234   : > { %2743 = vmatprep.subr.msk.mxu0 %vm802_vm2, %v3419_v12 }
 0x235   : > { %2744 = vmatpush3.xpose.msk.msra.mxu0 %vm802_vm2, %v3419_v12  ;;  %v3425_v13 = vld [vmem:[#allocation3 + $0x10] sm:$0xff]  ;;  %v3445_v17 = vpop.f32.mrf.mxu1 }
 0x236   : > { %2745 = vmatprep.subr.msk.mxu0 %vm802_vm2, %v3425_v13 }
 0x239   : > { %2746 = vmatpush3.xpose.msk.msra.mxu0 %vm802_vm2, %v3425_v13 }
 0x23a   : > { %2747 = vmatprep.subr.msk.mxu0 %vm802_vm2, %v3431_v14 }
 0x23d   : > { %2748 = vmatpush3.xpose.msk.msra.mxu0 %vm802_vm2, %v3431_v14 }
 0x23e   : > { %2749 = vmatprep.subr.msk.mxu0 %vm802_vm2, %v3437_v15 }
 0x241   : > { %2750 = vmatpush3.xpose.msk.msra.mxu0 %vm802_vm2, %v3437_v15 }
 0x244   : > { %2752 = vmatmul.mubr.msk.f32.vlgmr.msra.gmra.mxu0 %vm802_vm2, %v3413_v10 }
 0x245   : > { %2754 = vmatprep.mubr.msk.f32.mxu0 %vm802_vm2, %v3445_v17 }
 0x248   : > { %2755 = vmatmul.mubr.msk.f32.gmra.mxu0 %vm802_vm2, %v3441_v16 }
 0x304   : > { %v2753_v20 = vpop.f32.mrf.mxu0 }
 0x305   : > { %v915_v21 = vsel %vm801_vm3, %v2753_v20, -1e+30 }
 0x306   : > { %v893_v22 = vpop.f32.mrf.mxu0  ;;  %v921_v23 = vsel %vm477_vm0, %v915_v21, -inf }
 0x307   : > { %v914_v24 = vsel %vm801_vm3, %v893_v22, -1e+30  ;;  %922 = vmax.xlane.f32.xlu1 %v921_v23 }
 0x308   : > { %v2756_v25 = vpop.f32.mrf.mxu0  ;;  %v918_v26 = vsel %vm477_vm0, %v914_v24, -inf }
 0x309   : > { %v917_v27 = vsel %vm801_vm3, %v2756_v25, -1e+30  ;;  %919 = vmax.xlane.f32.xlu0 %v918_v26 }
 0x30a   : > { %v903_v28 = vpop.f32.mrf.mxu0  ;;  %v927_v29 = vsel %vm477_vm0, %v917_v27, -inf }
 0x30b   : > { %v916_v30 = vsel %vm801_vm3, %v903_v28, -1e+30  ;;  %928 = vmax.xlane.f32.xlu1 %v927_v29 }
 0x30c   : > { %v924_v31 = vsel %vm477_vm0, %v916_v30, -inf }
 0x30d   : > { %925 = vmax.xlane.f32.xlu0 %v924_v31 }
 0x31c   : > { %671 = vrot.lane.b32.xlu1 %v2728_v8, %s3185_s29 }
 0x320   : > { %667 = vrot.lane.b32.xlu1 %v2725_v6, %s3185_s29 }
 0x323   : > { %669 = vrot.lane.b32.xlu0 %v647_v9, %s3185_s29 }
 0x324   : > { %665 = vrot.lane.b32.xlu1 %v637_v7, %s3185_s29 }
 0x328   : > { %1073 = vrot.lane.b32.xlu1 %v3419_v12, %s3186_s16 }
 0x390   : > { %v923_v32 = vpop.xlane.xlu1 %922 }
 0x391   : > { %v931_v33 = vsub.f32 %v915_v21, %v923_v32 }
 0x392   : > { %v920_v34 = vpop.xlane.xlu0 %919 }
 0x393   : > { %v936_v35 = vmul.f32 1.442695, %v931_v33  ;;  %v930_v36 = vsub.f32 %v914_v24, %v920_v34 }
 0x394   : > { %v929_v37 = vpop.xlane.xlu1 %928 }
 0x395   : > { %2996 = vpow2.f32 %v936_v35  ;;  %v934_v38 = vmul.f32 1.442695, %v930_v36  ;;  %v933_v39 = vsub.f32 %v917_v27, %v929_v37 }
 0x396   : > { %v926_v40 = vpop.xlane.xlu0 %925 }
 0x397   : > { %2998 = vpow2.f32 %v934_v38  ;;  %v940_v41 = vmul.f32 1.442695, %v933_v39  ;;  %v932_v42 = vsub.f32 %v916_v30, %v926_v40 }
 0x398   : > { %v672_v43 = vpop.permute.xlu1 %671 }
 0x399   : > { %3000 = vpow2.f32 %v940_v41  ;;  %v938_v44 = vmul.f32 1.442695, %v932_v42  ;;  %680 = vst.msk [vmem:[#allocation4 + $0x18] sm:$0xff] %vm656_vm1, %v672_v43 }
 0x39a   : > { %v670_v45 = vpop.permute.xlu0 %669 }
 0x39b   : > { %679 = vst.msk [vmem:[#allocation4 + $0x10] sm:$0xff] %vm656_vm1, %v670_v45  ;;  %3002 = vpow2.f32 %v938_v44 }
 0x39c   : > { %v668_v46 = vpop.permute.xlu1 %667 }
 0x39d   : > { %678 = vst.msk [vmem:[#allocation4 + $0x8] sm:$0xff] %vm656_vm1, %v668_v46 }
 0x3a0   : > { %v666_v47 = vpop.permute.xlu1 %665  ;;  %v3473_v48 = vld [vmem:[#allocation4 + $0x18] sm:$0xff] }
 0x3a1   : > { %677 = vst.msk [vmem:[#allocation4] sm:$0xff] %vm656_vm1, %v666_v47  ;;  %2757 = vmatprep.subr.mxu1 %v3473_v48 }
 0x3a2   : > { %v2997_v49 = vpop.eup %2996  ;;  %2758 = vmatpush3.msra.mxu1 %v3473_v48  ;;  %v3478_v50 = vld [vmem:[#allocation4 + $0x10] sm:$0xff] }
 0x3a3   : > { %2759 = vmatprep.subr.mxu1 %v3478_v50  ;;  %v945_v51 = vsel %vm477_vm0, %v2997_v49, 0.0 }
 0x3a4   : > { %v2999_v52 = vpop.eup %2998  ;;  %946 = vadd.xlane.f32.xlu1 %v945_v51  ;;  %2760 = vmatpush3.msra.mxu1 %v3478_v50  ;;  %v3483_v53 = vld [vmem:[#allocation4 + $0x8] sm:$0xff]  ;;  %v1074_v59 = vpop.permute.xlu1 %1073 }
 0x3a5   : > { %2761 = vmatprep.subr.mxu1 %v3483_v53  ;;  %v942_v54 = vsel %vm477_vm0, %v2999_v52, 0.0 }
 0x3a6   : > { %v3001_v55 = vpop.eup %3000  ;;  %943 = vadd.xlane.f32.xlu0 %v942_v54  ;;  %2762 = vmatpush3.msra.mxu1 %v3483_v53 }
 0x3a7   : > { %v951_v57 = vsel %vm477_vm0, %v3001_v55, 0.0 }
 0x3a8   : > { %v3488_v56 = vld [vmem:[#allocation4] sm:$0xff]  ;;  %v3003_v58 = vpop.eup %3002 }
 0x3a9   : > { %2763 = vmatprep.subr.mxu1 %v3488_v56  ;;  %v948_v60 = vsel %vm477_vm0, %v3003_v58, 0.0 }
 0x3aa   : > { %952 = vadd.xlane.f32.xlu0 %v951_v57  ;;  %2764 = vmatpush3.msra.mxu1 %v3488_v56 }
 0x3ab   : > { %2771 = vmatprep.subr.msk.mxu1 %vm802_vm2, %v1074_v59 }
 0x3ae   : > { %949 = vadd.xlane.f32.xlu0 %v948_v60 }
 0x3b5   : > { %1071 = vrot.lane.b32.xlu1 %v3425_v13, %s3186_s16 }
 0x3b9   : > { %1067 = vrot.lane.b32.xlu1 %v3437_v15, %s3186_s16 }
 0x3bd   : > { %1061 = vrot.lane.b32.xlu1 %v3413_v10, %s3186_s16 }
 0x3c1   : > { %1065 = vrot.lane.b32.xlu1 %v3441_v16, %s3186_s16 }
 0x3c4   : > { %1069 = vrot.lane.b32.xlu0 %v3431_v14, %s3186_s16 }
 0x3c8   : > { %1059 = vrot.lane.b32.xlu0 %v3415_v11, %s3186_s16 }
 0x3cc   : > { %1063 = vrot.lane.b32.xlu0 %v3445_v17, %s3186_s16 }
 0x42d   : > { %v947_v61 = vpop.xlane.xlu1 %946 }
 0x42e   : > { %3004 = vrcp.f32 %v947_v61 }
 0x42f   : > { %v944_v62 = vpop.xlane.xlu0 %943 }
 0x430   : > { %3006 = vrcp.f32 %v944_v62 }
 0x431   : > { %v1072_v5 = vpop.permute.xlu1 %1071 }
 0x433   : > { %v953_v63 = vpop.xlane.xlu0 %952 }
 0x434   : > { %3008 = vrcp.f32 %v953_v63 }
 0x435   : > { %v1068_v20 = vpop.permute.xlu1 %1067 }
 0x437   : > { %v950_v0 = vpop.xlane.xlu0 %949 }
 0x438   : > { %3010 = vrcp.f32 %v950_v0 }
 0x439   : > { %v1062_v22 = vpop.permute.xlu1 %1061 }
 0x43b   : > { %v3005_v1 = vpop.eup %3004  ;;  %v1070_v6 = vpop.permute.xlu0 %1069 }
 0x43c   : > { %v959_v4 = vmul.f32 %v3005_v1, %v2997_v49 }
 0x43d   : > { %v3007_v2 = vpop.eup %3006  ;;  %v1066_v24 = vpop.permute.xlu1 %1065 }
 0x43e   : > { %v958_v3 = vmul.f32 %v3007_v2, %v2999_v52 }
 0x43f   : > { %v1060_v21 = vpop.permute.xlu0 %1059 }
 0x440   : > { %2765 = vmatprep.mubr.msk.f32.mxu1 %vm477_vm0, %v958_v3 }
 0x441   : > { %2766 = vmatmul.mubr.msk.f32.vlgmr.msra.gmra.mxu1 %vm477_vm0, %v959_v4  ;;  %v3009_v7 = vpop.eup %3008 }
 0x442   : > { %2772 = vmatpush3.xpose.msk.msra.mxu1 %vm802_vm2, %v1074_v59  ;;  %v961_v18 = vmul.f32 %v3009_v7, %v3001_v55 }
 0x443   : > { %2773 = vmatprep.subr.msk.mxu1 %vm802_vm2, %v1072_v5  ;;  %v1064_v23 = vpop.permute.xlu0 %1063 }
 0x445   : > { %v3011_v8 = vpop.eup %3010 }
 0x446   : > { %2774 = vmatpush3.xpose.msk.msra.mxu1 %vm802_vm2, %v1072_v5  ;;  %v960_v9 = vmul.f32 %v3011_v8, %v3003_v58 }
 0x447   : > { %2775 = vmatprep.subr.msk.mxu1 %vm802_vm2, %v1070_v6 }
 0x448   : > { %2768 = vmatprep.mubr.msk.f32.mxu1 %vm477_vm0, %v960_v9 }
 0x449   : > { %2769 = vmatmul.mubr.msk.f32.gmra.mxu1 %vm477_vm0, %v961_v18 }
 0x44a   : > { %2776 = vmatpush3.xpose.msk.msra.mxu1 %vm802_vm2, %v1070_v6  ;;  %2779 = vmatprep.mubr.msk.f32.mxu1 %vm802_vm2, %v1060_v21 }
 0x44b   : > { %2777 = vmatprep.subr.msk.mxu1 %vm802_vm2, %v1068_v20 }
 0x44e   : > { %2778 = vmatpush3.xpose.msk.msra.mxu1 %vm802_vm2, %v1068_v20 }
 0x451   : > { %2780 = vmatmul.mubr.msk.f32.vlgmr.msra.gmra.mxu1 %vm802_vm2, %v1062_v22 }
 0x452   : > { %2782 = vmatprep.mubr.msk.f32.mxu1 %vm802_vm2, %v1064_v23 }
 0x455   : > { %2783 = vmatmul.mubr.msk.f32.gmra.mxu1 %vm802_vm2, %v1066_v24 }
 0x501   : > { %v3524_v25 = vpop.f32.mrf.mxu1 }
 0x503   : > { %v3526_v26 = vpop.f32.mrf.mxu1 }
 0x509   : > { %v3528_v27 = vpop.f32.mrf.mxu1 }
 0x50b   : > { %v3530_v28 = vpop.f32.mrf.mxu1 }
 0x511   : > { %v2781_v29 = vpop.f32.mrf.mxu1 }
 0x512   : > { %v1177_v30 = vsel %vm801_vm3, %v2781_v29, -1e+30 }
 0x513   : > { %v1157_v31 = vpop.f32.mrf.mxu1  ;;  %v1183_v32 = vsel %vm477_vm0, %v1177_v30, -inf }
 0x514   : > { %v1176_v33 = vsel %vm801_vm3, %v1157_v31, -1e+30  ;;  %1184 = vmax.xlane.f32.xlu1 %v1183_v32 }
 0x515   : > { %v2784_v34 = vpop.f32.mrf.mxu1  ;;  %v1180_v35 = vsel %vm477_vm0, %v1176_v33, -inf }
 0x516   : > { %v1179_v36 = vsel %vm801_vm3, %v2784_v34, -1e+30  ;;  %1181 = vmax.xlane.f32.xlu0 %v1180_v35 }
 0x517   : > { %v1167_v37 = vpop.f32.mrf.mxu1  ;;  %v1189_v38 = vsel %vm477_vm0, %v1179_v36, -inf }
 0x518   : > { %v1178_v39 = vsel %vm801_vm3, %v1167_v37, -1e+30 }
 0x519   : > { %v1186_v40 = vsel %vm477_vm0, %v1178_v39, -inf }
 0x51a   : > { %1190 = vmax.xlane.f32.xlu0 %v1189_v38 }
 0x51e   : > { %1187 = vmax.xlane.f32.xlu0 %v1186_v40 }
 0x525   : > { %1232 = vrot.lane.b32.xlu1 %v3478_v50, %s3186_s16 }
 0x529   : > { %1230 = vrot.lane.b32.xlu1 %v3483_v53, %s3186_s16 }
 0x52d   : > { %1228 = vrot.lane.b32.xlu1 %v3488_v56, %s3186_s16 }
 0x534   : > { %1234 = vrot.lane.b32.xlu0 %v3473_v48, %s3186_s16 }
 0x59d   : > { %v1185_v41 = vpop.xlane.xlu1 %1184 }
 0x59e   : > { %v1193_v42 = vsub.f32 %v1177_v30, %v1185_v41 }
 0x59f   : > { %v1182_v43 = vpop.xlane.xlu0 %1181 }
 0x5a0   : > { %v1198_v44 = vmul.f32 1.442695, %v1193_v42  ;;  %v1192_v45 = vsub.f32 %v1176_v33, %v1182_v43 }
 0x5a1   : > { %v1233_v49 = vpop.permute.xlu1 %1232 }
 0x5a2   : > { %3012 = vpow2.f32 %v1198_v44  ;;  %v1196_v46 = vmul.f32 1.442695, %v1192_v45 }
 0x5a3   : > { %v1191_v47 = vpop.xlane.xlu0 %1190 }
 0x5a4   : > { %3014 = vpow2.f32 %v1196_v46  ;;  %v1195_v61 = vsub.f32 %v1179_v36, %v1191_v47 }
 0x5a5   : > { %v1231_v52 = vpop.permute.xlu1 %1230 }
 0x5a6   : > { %v1202_v63 = vmul.f32 1.442695, %v1195_v61 }
 0x5a7   : > { %v1188_v51 = vpop.xlane.xlu0 %1187 }
 0x5a8   : > { %v1194_v62 = vsub.f32 %v1178_v39, %v1188_v51  ;;  %3016 = vpow2.f32 %v1202_v63 }
 0x5a9   : > { %v1229_v59 = vpop.permute.xlu1 %1228 }
 0x5aa   : > { %v1200_v0 = vmul.f32 1.442695, %v1194_v62 }
 0x5ab   : > { %v1235_v54 = vpop.permute.xlu0 %1234 }
 0x5ac   : > { %2785 = vmatprep.subr.mxu0 %v1235_v54  ;;  %3018 = vpow2.f32 %v1200_v0 }
 0x5ad   : > { %2786 = vmatpush3.msra.mxu0 %v1235_v54 }
 0x5ae   : > { %2787 = vmatprep.subr.mxu0 %v1233_v49 }
 0x5af   : > { %v3013_v55 = vpop.eup %3012  ;;  %2788 = vmatpush3.msra.mxu0 %v1233_v49 }
 0x5b0   : > { %2789 = vmatprep.subr.mxu0 %v1231_v52  ;;  %v1207_v57 = vsel %vm477_vm0, %v3013_v55, 0.0 }
 0x5b1   : > { %v3015_v58 = vpop.eup %3014  ;;  %1208 = vadd.xlane.f32.xlu1 %v1207_v57  ;;  %2790 = vmatpush3.msra.mxu0 %v1231_v52 }
 0x5b2   : > { %2791 = vmatprep.subr.mxu0 %v1229_v59  ;;  %v1204_v60 = vsel %vm477_vm0, %v3015_v58, 0.0 }
 0x5b3   : > { %1205 = vadd.xlane.f32.xlu0 %v1204_v60  ;;  %2792 = vmatpush3.msra.mxu0 %v1229_v59 }
 0x5b5   : > { %v3017_v1 = vpop.eup %3016 }
 0x5b6   : > { %v1213_v3 = vsel %vm477_vm0, %v3017_v1, 0.0 }
 0x5b9   : > { %v3019_v2 = vpop.eup %3018 }
 0x5ba   : > { %v1210_v4 = vsel %vm477_vm0, %v3019_v2, 0.0 }
 0x5c2   : > { %1349 = vrot.lane.b32.xlu1 %v3425_v13, %s3187_s22 }
 0x5c9   : > { %1351 = vrot.lane.b32.xlu0 %v3419_v12, %s3187_s22 }
 0x5e6   : > { %1214 = vadd.xlane.f32.xlu1 %v1213_v3 }
 0x5e8   : > { %1211 = vadd.xlane.f32.xlu0 %v1210_v4 }
 0x5f7   : > { %1345 = vrot.lane.b32.xlu1 %v3437_v15, %s3187_s22 }
 0x5fb   : > { %1339 = vrot.lane.b32.xlu1 %v3413_v10, %s3187_s22 }
 0x5fe   : > { %1347 = vrot.lane.b32.xlu0 %v3431_v14, %s3187_s22 }
 0x5ff   : > { %1343 = vrot.lane.b32.xlu1 %v3441_v16, %s3187_s22 }
 0x602   : > { %1337 = vrot.lane.b32.xlu0 %v3415_v11, %s3187_s22 }
 0x606   : > { %1341 = vrot.lane.b32.xlu0 %v3445_v17, %s3187_s22 }
 0x63a   : > { %v1209_v5 = vpop.xlane.xlu1 %1208 }
 0x63b   : > { %3020 = vrcp.f32 %v1209_v5 }
 0x63c   : > { %v1206_v6 = vpop.xlane.xlu0 %1205 }
 0x63d   : > { %3022 = vrcp.f32 %v1206_v6 }
 0x63e   : > { %v1350_v21 = vpop.permute.xlu1 %1349 }
 0x640   : > { %v1352_v7 = vpop.permute.xlu0 %1351 }
 0x641   : > { %2799 = vmatprep.subr.msk.mxu0 %vm802_vm2, %v1352_v7 }
 0x648   : > { %v3021_v8 = vpop.eup %3020 }
 0x649   : > { %v1221_v20 = vmul.f32 %v3021_v8, %v3013_v55 }
 0x64a   : > { %v3023_v9 = vpop.eup %3022 }
 0x64b   : > { %v1220_v18 = vmul.f32 %v3023_v9, %v3015_v58 }
 0x64d   : > { %2793 = vmatprep.mubr.msk.f32.mxu0 %vm477_vm0, %v1220_v18 }
 0x64e   : > { %2794 = vmatmul.mubr.msk.f32.vlgmr.msra.gmra.mxu0 %vm477_vm0, %v1221_v20 }
 0x64f   : > { %2800 = vmatpush3.xpose.msk.msra.mxu0 %vm802_vm2, %v1352_v7 }
 0x650   : > { %2801 = vmatprep.subr.msk.mxu0 %vm802_vm2, %v1350_v21 }
 0x653   : > { %2802 = vmatpush3.xpose.msk.msra.mxu0 %vm802_vm2, %v1350_v21 }
 0x66f   : > { %v1215_v22 = vpop.xlane.xlu1 %1214 }
 0x670   : > { %3024 = vrcp.f32 %v1215_v22 }
 0x671   : > { %v1212_v23 = vpop.xlane.xlu0 %1211 }
 0x672   : > { %3026 = vrcp.f32 %v1212_v23 }
 0x673   : > { %v1346_v29 = vpop.permute.xlu1 %1345 }
 0x675   : > { %v1348_v24 = vpop.permute.xlu0 %1347 }
 0x676   : > { %2803 = vmatprep.subr.msk.mxu0 %vm802_vm2, %v1348_v24 }
 0x677   : > { %2804 = vmatpush3.xpose.msk.msra.mxu0 %vm802_vm2, %v1348_v24  ;;  %v1340_v35 = vpop.permute.xlu1 %1339 }
 0x678   : > { %2805 = vmatprep.subr.msk.mxu0 %vm802_vm2, %v1346_v29 }
 0x679   : > { %v1338_v33 = vpop.permute.xlu0 %1337 }
 0x67b   : > { %2806 = vmatpush3.xpose.msk.msra.mxu0 %vm802_vm2, %v1346_v29  ;;  %v1344_v37 = vpop.permute.xlu1 %1343 }
 0x67d   : > { %v3025_v30 = vpop.eup %3024  ;;  %v1342_v36 = vpop.permute.xlu0 %1341 }
 0x67e   : > { %v1223_v34 = vmul.f32 %v3025_v30, %v3017_v1 }
 0x67f   : > { %v3027_v31 = vpop.eup %3026 }
 0x680   : > { %v1222_v32 = vmul.f32 %v3027_v31, %v3019_v2 }
 0x682   : > { %2796 = vmatprep.mubr.msk.f32.mxu0 %vm477_vm0, %v1222_v32 }
 0x683   : > { %2797 = vmatmul.mubr.msk.f32.gmra.mxu0 %vm477_vm0, %v1223_v34 }
 0x684   : > { %2807 = vmatprep.mubr.msk.f32.mxu0 %vm802_vm2, %v1338_v33 }
 0x687   : > { %2808 = vmatmul.mubr.msk.f32.vlgmr.msra.gmra.mxu0 %vm802_vm2, %v1340_v35 }
 0x688   : > { %2810 = vmatprep.mubr.msk.f32.mxu0 %vm802_vm2, %v1342_v36 }
 0x68b   : > { %2811 = vmatmul.mubr.msk.f32.gmra.mxu0 %vm802_vm2, %v1344_v37 }
 0x70e   : > { %v3588_v38 = vpop.f32.mrf.mxu0 }
 0x710   : > { %v3590_v39 = vpop.f32.mrf.mxu0 }
 0x743   : > { %v3592_v40 = vpop.f32.mrf.mxu0 }
 0x745   : > { %v3594_v41 = vpop.f32.mrf.mxu0 }
 0x747   : > { %v2809_v42 = vpop.f32.mrf.mxu0 }
 0x748   : > { %v1455_v43 = vsel %vm801_vm3, %v2809_v42, -1e+30 }
 0x749   : > { %v1435_v44 = vpop.f32.mrf.mxu0  ;;  %v1461_v45 = vsel %vm477_vm0, %v1455_v43, -inf }
 0x74a   : > { %v1454_v46 = vsel %vm801_vm3, %v1435_v44, -1e+30  ;;  %1462 = vmax.xlane.f32.xlu1 %v1461_v45 }
 0x74b   : > { %v2812_v47 = vpop.f32.mrf.mxu0  ;;  %v1458_v49 = vsel %vm477_vm0, %v1454_v46, -inf }
 0x74c   : > { %v1457_v51 = vsel %vm801_vm3, %v2812_v47, -1e+30  ;;  %1459 = vmax.xlane.f32.xlu0 %v1458_v49 }
 0x74d   : > { %v1445_v52 = vpop.f32.mrf.mxu0  ;;  %v1467_v54 = vsel %vm477_vm0, %v1457_v51, -inf }
 0x74e   : > { %v1456_v55 = vsel %vm801_vm3, %v1445_v52, -1e+30 }
 0x74f   : > { %v1464_v57 = vsel %vm477_vm0, %v1456_v55, -inf }
 0x750   : > { %1468 = vmax.xlane.f32.xlu0 %v1467_v54 }
 0x754   : > { %1465 = vmax.xlane.f32.xlu0 %v1464_v57 }
 0x75b   : > { %1506 = vrot.lane.b32.xlu1 %v3478_v50, %s3187_s22 }
 0x75f   : > { %1504 = vrot.lane.b32.xlu1 %v3483_v53, %s3187_s22 }
 0x763   : > { %1502 = vrot.lane.b32.xlu1 %v3488_v56, %s3187_s22 }
 0x76a   : > { %1508 = vrot.lane.b32.xlu0 %v3473_v48, %s3187_s22 }
 0x7d3   : > { %v1463_v58 = vpop.xlane.xlu1 %1462 }
 0x7d4   : > { %v1471_v59 = vsub.f32 %v1455_v43, %v1463_v58 }
 0x7d5   : > { %v1460_v60 = vpop.xlane.xlu0 %1459 }
 0x7d6   : > { %v1476_v61 = vmul.f32 1.442695, %v1471_v59  ;;  %v1470_v62 = vsub.f32 %v1454_v46, %v1460_v60 }
 0x7d7   : > { %v1507_v1 = vpop.permute.xlu1 %1506 }
 0x7d8   : > { %3028 = vpow2.f32 %v1476_v61  ;;  %v1474_v63 = vmul.f32 1.442695, %v1470_v62 }
 0x7d9   : > { %v1469_v0 = vpop.xlane.xlu0 %1468 }
 0x7da   : > { %3030 = vpow2.f32 %v1474_v63  ;;  %v1473_v18 = vsub.f32 %v1457_v51, %v1469_v0 }
 0x7db   : > { %v1505_v3 = vpop.permute.xlu1 %1504 }
 0x7dc   : > { %v1480_v21 = vmul.f32 1.442695, %v1473_v18 }
 0x7dd   : > { %v1466_v2 = vpop.xlane.xlu0 %1465 }
 0x7de   : > { %v1472_v20 = vsub.f32 %v1456_v55, %v1466_v2  ;;  %3032 = vpow2.f32 %v1480_v21 }
 0x7df   : > { %v1503_v8 = vpop.permute.xlu1 %1502 }
 0x7e0   : > { %v1478_v22 = vmul.f32 1.442695, %v1472_v20 }
 0x7e1   : > { %v1509_v4 = vpop.permute.xlu0 %1508 }
 0x7e2   : > { %2813 = vmatprep.subr.mxu1 %v1509_v4  ;;  %3034 = vpow2.f32 %v1478_v22 }
 0x7e3   : > { %2814 = vmatpush3.msra.mxu1 %v1509_v4 }
 0x7e4   : > { %2815 = vmatprep.subr.mxu1 %v1507_v1 }
 0x7e5   : > { %v3029_v5 = vpop.eup %3028  ;;  %2816 = vmatpush3.msra.mxu1 %v1507_v1 }
 0x7e6   : > { %2817 = vmatprep.subr.mxu1 %v1505_v3  ;;  %v1485_v6 = vsel %vm477_vm0, %v3029_v5, 0.0 }
 0x7e7   : > { %v3031_v7 = vpop.eup %3030  ;;  %1486 = vadd.xlane.f32.xlu1 %v1485_v6  ;;  %2818 = vmatpush3.msra.mxu1 %v1505_v3 }
 0x7e8   : > { %2819 = vmatprep.subr.mxu1 %v1503_v8  ;;  %v1482_v9 = vsel %vm477_vm0, %v3031_v7, 0.0 }
 0x7e9   : > { %1483 = vadd.xlane.f32.xlu0 %v1482_v9  ;;  %2820 = vmatpush3.msra.mxu1 %v1503_v8 }
 0x7eb   : > { %v3033_v23 = vpop.eup %3032 }
 0x7ec   : > { %v1491_v29 = vsel %vm477_vm0, %v3033_v23, 0.0 }
 0x7ef   : > { %v3035_v24 = vpop.eup %3034 }
 0x7f0   : > { %v1488_v30 = vsel %vm477_vm0, %v3035_v24, 0.0 }
 0x7f8   : > { %1623 = vrot.lane.b32.xlu1 %v3425_v13, %s3188_s23 }
 0x7ff   : > { %1625 = vrot.lane.b32.xlu0 %v3419_v12, %s3188_s23 }
 0x81c   : > { %1492 = vadd.xlane.f32.xlu1 %v1491_v29 }
 0x81e   : > { %1489 = vadd.xlane.f32.xlu0 %v1488_v30 }
 0x82d   : > { %1619 = vrot.lane.b32.xlu1 %v3437_v15, %s3188_s23 }
 0x831   : > { %1613 = vrot.lane.b32.xlu1 %v3413_v10, %s3188_s23 }
 0x834   : > { %1621 = vrot.lane.b32.xlu0 %v3431_v14, %s3188_s23 }
 0x835   : > { %1617 = vrot.lane.b32.xlu1 %v3441_v16, %s3188_s23 }
 0x838   : > { %1611 = vrot.lane.b32.xlu0 %v3415_v11, %s3188_s23 }
 0x83c   : > { %1615 = vrot.lane.b32.xlu0 %v3445_v17, %s3188_s23 }
 0x870   : > { %v1487_v12 = vpop.xlane.xlu1 %1486 }
 0x871   : > { %3036 = vrcp.f32 %v1487_v12 }
 0x872   : > { %v1484_v13 = vpop.xlane.xlu0 %1483 }
 0x873   : > { %3038 = vrcp.f32 %v1484_v13 }
 0x874   : > { %v1624_v16 = vpop.permute.xlu1 %1623 }
 0x876   : > { %v1626_v15 = vpop.permute.xlu0 %1625 }
 0x877   : > { %2827 = vmatprep.subr.msk.mxu1 %vm802_vm2, %v1626_v15 }
 0x87e   : > { %v3037_v10 = vpop.eup %3036 }
 0x87f   : > { %v1499_v14 = vmul.f32 %v3037_v10, %v3029_v5 }
 0x880   : > { %v3039_v31 = vpop.eup %3038 }
 0x881   : > { %v1498_v32 = vmul.f32 %v3039_v31, %v3031_v7 }
 0x883   : > { %2821 = vmatprep.mubr.msk.f32.mxu1 %vm477_vm0, %v1498_v32 }
 0x884   : > { %2822 = vmatmul.mubr.msk.f32.vlgmr.msra.gmra.mxu1 %vm477_vm0, %v1499_v14 }
 0x885   : > { %2828 = vmatpush3.xpose.msk.msra.mxu1 %vm802_vm2, %v1626_v15 }
 0x886   : > { %2829 = vmatprep.subr.msk.mxu1 %vm802_vm2, %v1624_v16 }
 0x889   : > { %2830 = vmatpush3.xpose.msk.msra.mxu1 %vm802_vm2, %v1624_v16 }
 0x8a5   : > { %v1493_v11 = vpop.xlane.xlu1 %1492 }
 0x8a6   : > { %3040 = vrcp.f32 %v1493_v11 }
 0x8a7   : > { %v1490_v17 = vpop.xlane.xlu0 %1489 }
 0x8a8   : > { %3042 = vrcp.f32 %v1490_v17 }
 0x8a9   : > { %v1620_v34 = vpop.permute.xlu1 %1619 }
 0x8ab   : > { %v1622_v33 = vpop.permute.xlu0 %1621 }
 0x8ac   : > { %2831 = vmatprep.subr.msk.mxu1 %vm802_vm2, %v1622_v33 }
 0x8ad   : > { %2832 = vmatpush3.xpose.msk.msra.mxu1 %vm802_vm2, %v1622_v33  ;;  %v1614_v44 = vpop.permute.xlu1 %1613 }
 0x8ae   : > { %2833 = vmatprep.subr.msk.mxu1 %vm802_vm2, %v1620_v34 }
 0x8af   : > { %v1612_v42 = vpop.permute.xlu0 %1611 }
 0x8b1   : > { %2834 = vmatpush3.xpose.msk.msra.mxu1 %vm802_vm2, %v1620_v34  ;;  %v1618_v46 = vpop.permute.xlu1 %1617 }
 0x8b3   : > { %v3041_v35 = vpop.eup %3040  ;;  %v1616_v45 = vpop.permute.xlu0 %1615 }
 0x8b4   : > { %v1501_v43 = vmul.f32 %v3041_v35, %v3033_v23  ;;  %v1964_v35 = vld [vmem:[%s3882_s5 + $0x38] sm:$0xff] }
 0x8b5   : > { %v3043_v36 = vpop.eup %3042 }
 0x8b6   : > { %v1500_v37 = vmul.f32 %v3043_v36, %v3035_v24  ;;  %v1963_v36 = vld [vmem:[%s3882_s5 + $0x30] sm:$0xff] }
 0x8b8   : > { %2824 = vmatprep.mubr.msk.f32.mxu1 %vm477_vm0, %v1500_v37  ;;  %v1962_v37 = vld [vmem:[%s3882_s5 + $0x28] sm:$0xff] }
 0x8b9   : > { %2825 = vmatmul.mubr.msk.f32.gmra.mxu1 %vm477_vm0, %v1501_v43  ;;  %v1960_v43 = vld [vmem:[%s3882_s5 + $0x18] sm:$0xff] }
 0x8ba   : > { %2835 = vmatprep.mubr.msk.f32.mxu1 %vm802_vm2, %v1612_v42  ;;  %v1961_v42 = vld [vmem:[%s3882_s5 + $0x20] sm:$0xff] }
 0x8bd   : > { %2836 = vmatmul.mubr.msk.f32.vlgmr.msra.gmra.mxu1 %vm802_vm2, %v1614_v44  ;;  %v1959_v44 = vld [vmem:[%s3882_s5 + $0x10] sm:$0xff] }
 0x8be   : > { %2838 = vmatprep.mubr.msk.f32.mxu1 %vm802_vm2, %v1616_v45  ;;  %v1958_v45 = vld [vmem:[%s3882_s5 + $0x8] sm:$0xff] }
 0x8c1   : > { %2839 = vmatmul.mubr.msk.f32.gmra.mxu1 %vm802_vm2, %v1618_v46  ;;  %v1957_v46 = vld [vmem:[%s3882_s5] sm:$0xff] }
 0x944   : > { %v2823_v47 = vpop.f32.mrf.mxu1 }
 0x946   : > { %v1592_v49 = vpop.f32.mrf.mxu1 }
 0x979   : > { %v2826_v51 = vpop.f32.mrf.mxu1 }
 0x97b   : > { %v1602_v52 = vpop.f32.mrf.mxu1 }
 0x97d   : > { %v2837_v54 = vpop.f32.mrf.mxu1 }
 0x97e   : > { %v1729_v55 = vsel %vm801_vm3, %v2837_v54, -1e+30 }
 0x97f   : > { %v1709_v57 = vpop.f32.mrf.mxu1  ;;  %v1735_v58 = vsel %vm477_vm0, %v1729_v55, -inf }
 0x980   : > { %v1728_v59 = vsel %vm801_vm3, %v1709_v57, -1e+30  ;;  %1736 = vmax.xlane.f32.xlu1 %v1735_v58 }
 0x981   : > { %v2840_v60 = vpop.f32.mrf.mxu1  ;;  %v1732_v61 = vsel %vm477_vm0, %v1728_v59, -inf }
 0x982   : > { %1733 = vmax.xlane.f32.xlu0 %v1732_v61  ;;  %v1731_v1 = vsel %vm801_vm3, %v2840_v60, -1e+30 }
 0x983   : > { %v1719_v62 = vpop.f32.mrf.mxu1  ;;  %v1741_v2 = vsel %vm477_vm0, %v1731_v1, -inf }
 0x984   : > { %v1730_v63 = vsel %vm801_vm3, %v1719_v62, -1e+30 }
 0x985   : > { %v1738_v0 = vsel %vm477_vm0, %v1730_v63, -inf }
 0x986   : > { %1739 = vmax.xlane.f32.xlu0 %v1738_v0 }
 0x98a   : > { %1742 = vmax.xlane.f32.xlu0 %v1741_v2 }
 0xa09   : > { %v1737_v3 = vpop.xlane.xlu1 %1736 }
 0xa0a   : > { %v1745_v4 = vsub.f32 %v1729_v55, %v1737_v3 }
 0xa0b   : > { %v1734_v5 = vpop.xlane.xlu0 %1733 }
 0xa0c   : > { %v1750_v6 = vmul.f32 1.442695, %v1745_v4  ;;  %v1744_v7 = vsub.f32 %v1728_v59, %v1734_v5 }
 0xa0e   : > { %3044 = vpow2.f32 %v1750_v6  ;;  %v1748_v8 = vmul.f32 1.442695, %v1744_v7 }
 0xa0f   : > { %v1740_v9 = vpop.xlane.xlu0 %1739 }
 0xa10   : > { %3046 = vpow2.f32 %v1748_v8  ;;  %v1746_v18 = vsub.f32 %v1730_v63, %v1740_v9 }
 0xa12   : > { %v1752_v20 = vmul.f32 1.442695, %v1746_v18 }
 0xa13   : > { %v1743_v21 = vpop.xlane.xlu0 %1742 }
 0xa14   : > { %3048 = vpow2.f32 %v1752_v20  ;;  %v1747_v22 = vsub.f32 %v1731_v1, %v1743_v21 }
 0xa16   : > { %v1754_v19 = vmul.f32 1.442695, %v1747_v22  ;;  %v2579_v22 = vld [vmem:[%s3883_s6] ss:$0 sm:$0xff] }
 0xa18   : > { %3050 = vpow2.f32 %v1754_v19  ;;  %v681_v19 = vld [vmem:[%s3346_s21] sm:$0xff] }
 0xa1b   : > { %v3045_v23 = vpop.eup %3044 }
 0xa1c   : > { %v1759_v24 = vsel %vm477_vm0, %v3045_v23, 0.0 }
 0xa1d   : > { %v3047_v29 = vpop.eup %3046  ;;  %1760 = vadd.xlane.f32.xlu1 %v1759_v24 }
 0xa1e   : > { %v1756_v30 = vsel %vm477_vm0, %v3047_v29, 0.0 }
 0xa1f   : > { %1757 = vadd.xlane.f32.xlu0 %v1756_v30 }
 0xa21   : > { %v3049_v12 = vpop.eup %3048 }
 0xa22   : > { %v1762_v13 = vsel %vm477_vm0, %v3049_v12, 0.0 }
 0xa23   : > { %1763 = vadd.xlane.f32.xlu0 %v1762_v13  ;;  %v684_v13 = vld [vmem:[%s3346_s21 + $0x18] sm:$0xff] }
 0xa25   : > { %v3051_v15 = vpop.eup %3050 }
 0xa26   : > { %v1765_v10 = vsel %vm477_vm0, %v3051_v15, 0.0 }
 0xa27   : > { %1766 = vadd.xlane.f32.xlu1 %v1765_v10 }
 0xa38   : > { %1780 = vrot.lane.b32.xlu1 %v3478_v50, %s3188_s23 }
 0xa39   : > { %1782 = vrot.lane.b32.xlu0 %v3473_v48, %s3188_s23 }
 0xa3c   : > { %1778 = vrot.lane.b32.xlu1 %v3483_v53, %s3188_s23 }
 0xa3d   : > { %1889 = vrot.lane.b32.xlu0 %v3590_v39, %s3189_s15 }
 0xa40   : > { %1776 = vrot.lane.b32.xlu1 %v3488_v56, %s3188_s23  ;;  %s2602_s23 = sshll.u32 %s3174_s28, 9 }
 0xa41   : > { %1905 = vrot.lane.b32.xlu0 %v1592_v49, %s3190_s14  ;;  %s3829_s24 = scalar_lea.hbm %s3890_s13, %s2602_s23 }
 0xa44   : > { %1891 = vrot.lane.b32.xlu1 %v3588_v38, %s3189_s15 }
 0xa45   : > { %1893 = vrot.lane.b32.xlu0 %v3594_v41, %s3189_s15 }
 0xa48   : > { %1907 = vrot.lane.b32.xlu1 %v2823_v47, %s3190_s14 }
 0xa49   : > { %1909 = vrot.lane.b32.xlu0 %v1602_v52, %s3190_s14 }
 0xa4c   : > { %1895 = vrot.lane.b32.xlu1 %v3592_v40, %s3189_s15  ;;  %s3191_s15 = smov 48  }
 0xa50   : > { %1911 = vrot.lane.b32.xlu1 %v2826_v51, %s3190_s14 }
 0xaa6   : > { %v1761_v50 = vpop.xlane.xlu1 %1760 }
 0xaa8   : > { %v1758_v48 = vpop.xlane.xlu0 %1757 }
 0xaa9   : > { %3052 = vrcp.f32 %v1758_v48 }
 0xaaa   : > { %3054 = vrcp.f32 %v1761_v50 }
 0xaac   : > { %v1764_v53 = vpop.xlane.xlu0 %1763 }
 0xaad   : > { %3056 = vrcp.f32 %v1764_v53  ;;  %v1956_v53 = vadd.f32 %v2579_v22, %v684_v13 }
 0xab0   : > { %v1767_v39 = vpop.xlane.xlu1 %1766  ;;  %v1783_v31 = vpop.permute.xlu0 %1782 }
 0xab1   : > { %3058 = vrcp.f32 %v1767_v39  ;;  %2841 = vmatprep.subr.mxu0 %v1783_v31 }
 0xab2   : > { %2842 = vmatpush3.msra.mxu0 %v1783_v31 }
 0xab4   : > { %v1781_v56 = vpop.permute.xlu1 %1780  ;;  %v1890_v55 = vpop.permute.xlu0 %1889 }
 0xab5   : > { %2843 = vmatprep.subr.mxu0 %v1781_v56  ;;  %v1933_v0 = vsel %vm802_vm2, %v3526_v26, %v1890_v55  ;;  %v2145_v55 = vld [vmem:[%s3886_s9 + $0x18] sm:$0xff] }
 0xab6   : > { %v3053_v38 = vpop.eup %3052  ;;  %2844 = vmatpush3.msra.mxu0 %v1781_v56  ;;  %2877 = vmatprep.subr.mxu1 %v2145_v55 }
 0xab7   : > { %v1772_v41 = vmul.f32 %v3053_v38, %v3047_v29  ;;  %v3055_v40 = vpop.eup %3054  ;;  %v683_v29 = vld [vmem:[%s3346_s21 + $0x10] sm:$0xff]  ;;  %2878 = vmatpush3.msra.mxu1 %v2145_v55 }
 0xab8   : > { %v1779_v32 = vpop.permute.xlu1 %1778  ;;  %v1773_v11 = vmul.f32 %v3055_v40, %v3045_v23  ;;  %v1906_v58 = vpop.permute.xlu0 %1905  ;;  %v1955_v48 = vadd.f32 %v2579_v22, %v683_v29 }
 0xab9   : > { %2845 = vmatprep.subr.mxu0 %v1779_v32  ;;  %2849 = vmatprep.mubr.msk.f32.mxu0 %vm477_vm0, %v1772_v41  ;;  %v1937_v1 = vsel %vm477_vm0, %v1933_v0, %v1906_v58  ;;  %v2143_v58 = vld [vmem:[%s3886_s9 + $0x8] sm:$0xff] }
 0xaba   : > { %2846 = vmatpush3.msra.mxu0 %v1779_v32  ;;  %v3057_v14 = vpop.eup %3056 }
 0xabb   : > { %v1774_v33 = vmul.f32 %v3057_v14, %v3049_v12 }
 0xabc   : > { %v1777_v16 = vpop.permute.xlu1 %1776  ;;  %v1894_v60 = vpop.permute.xlu0 %1893 }
 0xabd   : > { %2847 = vmatprep.subr.mxu0 %v1777_v16  ;;  %v1935_v26 = vsel %vm802_vm2, %v3530_v28, %v1894_v60  ;;  %v682_v28 = vld [vmem:[%s3346_s21 + $0x8] sm:$0xff]  ;;  %s458_s21 = sand.u32 1, %s3166_s26  }
 0xabe   : > { %v3059_v17 = vpop.eup %3058  ;;  %2848 = vmatpush3.msra.mxu0 %v1777_v16  ;;  %v1954_v23 = vadd.f32 %v2579_v22, %v682_v28  ;;  %s2518_s29 = sshll.u32 %s458_s21, 5  ;;  %s3832_s28 = scalar_lea.sflag [#allocation7], %s458_s21 }
 0xabf   : > { %2850 = vmatmul.mubr.msk.f32.vlgmr.msra.gmra.mxu0 %vm477_vm0, %v1773_v11  ;;  %v1775_v34 = vmul.f32 %v3059_v17, %v3051_v15  ;;  %2855 = vmatprep.subr.mxu0 %v1964_v35  ;;  %s460_s16 = scalar_lea.vmem [#allocation8], %s2518_s29  ;;  %s3106_s29 = sshll.u32 %s3192_s19, 4  ;;  %s3107_s29 = int_to_ptr.vmem [resolvable:$false] %s3106_s29 }
 0xac0   : > { %2852 = vmatprep.mubr.msk.f32.mxu0 %vm477_vm0, %v1774_v33  ;;  %2856 = vmatpush3.msra.mxu0 %v1964_v35  ;;  %v1892_v54 = vpop.permute.xlu1 %1891  ;;  %v1910_v62 = vpop.permute.xlu0 %1909  ;;  %s2426_s22 = sshll.u32 %s460_s16, 4  ;;  %s3108_s0 = scalar_lea.vmem %s3107_s29, 1024  ;;  %s3823_s22 = int_to_ptr.vmem [resolvable:$true] %s2426_s22 }
 0xac1   : > { %2857 = vmatprep.subr.mxu0 %v1963_v36  ;;  %v1934_v2 = vsel %vm802_vm2, %v3524_v25, %v1892_v54  ;;  %v1939_v25 = vsel %vm477_vm0, %v1935_v26, %v1910_v62  ;;  %s3102_s17 = scalar_lea.vmem %s3823_s22, 512  ;;  %p3109_p0 = scmp.lt.s32.totalorder %s3823_s22, %s3107_s29 }
 0xac2   : > { %2858 = vmatpush3.msra.mxu0 %v1963_v36  ;;  %p3103_p10 = scmp.ne.s32.totalorder %s3823_s22, %s3102_s17  ;;  %p3110_p1 = scmp.lt.s32.totalorder %s3108_s0, %s3102_s17 }
 0xac3   : > { %2853 = vmatmul.mubr.msk.f32.gmra.mxu0 %vm477_vm0, %v1775_v34  ;;  %2859 = vmatprep.subr.mxu0 %v1962_v37 }
 0xac4   : > { %2860 = vmatpush3.msra.mxu0 %v1962_v37  ;;  %v1908_v57 = vpop.permute.xlu1 %1907  ;;  %p3104_p11 = pnand %p3103_p10, %p3305_p4  ;;  %p3111_p2 = por %p3110_p1, %p3109_p0 }
 0xac5   : > { %2861 = vmatprep.subr.mxu0 %v1961_v42  ;;  %v1938_v4 = vsel %vm477_vm0, %v1934_v2, %v1908_v57  ;;  %v2144_v57 = vld [vmem:[%s3886_s9 + $0x10] sm:$0xff] }
 0xac6   : > { %2862 = vmatpush3.msra.mxu0 %v1961_v42  ;;  %2879 = vmatprep.subr.mxu1 %v2144_v57  ;;  %p3105_p13 = pneg %p3104_p11 }
 0xac7   : > { %2863 = vmatprep.subr.mxu0 %v1960_v43  ;;  %2880 = vmatpush3.msra.mxu1 %v2144_v57 }
 0xac8   : > { %2864 = vmatpush3.msra.mxu0 %v1960_v43  ;;  %v1896_v59 = vpop.permute.xlu1 %1895  ;;  %2881 = vmatprep.subr.mxu1 %v2143_v58  ;;  %p3112_p3 = pnand %p3111_p2, %p3105_p13 }
 0xac9   : > { %2865 = vmatprep.subr.mxu0 %v1959_v44  ;;  %v1936_v8 = vsel %vm802_vm2, %v3528_v27, %v1896_v59  ;;  %v1953_v27 = vadd.f32 %v2579_v22, %v681_v19  ;;  %v2142_v59 = vld [vmem:[%s3886_s9] sm:$0xff]  ;;  %2882 = vmatpush3.msra.mxu1 %v2143_v58 }
 0xaca   : > { %2866 = vmatpush3.msra.mxu0 %v1959_v44  ;;  %2883 = vmatprep.subr.mxu1 %v2142_v59 }
 0xacb   : > { %2867 = vmatprep.subr.mxu0 %v1958_v45  ;;  %2884 = vmatpush3.msra.mxu1 %v2142_v59 }
 0xacc   : > { %2868 = vmatpush3.msra.mxu0 %v1958_v45  ;;  %v1912_v61 = vpop.permute.xlu1 %1911 }
 0xacd   : > { %2869 = vmatprep.subr.mxu0 %v1957_v46  ;;  %v1940_v18 = vsel %vm477_vm0, %v1936_v8, %v1912_v61  ;;  %v2584_v8 = vld [vmem:[%s3884_s7] ss:$0 sm:$0xff] }
 0xace   : > { %2870 = vmatpush3.msra.mxu0 %v1957_v46 }
 0xb7f   : > { %v2851_v47 = vpop.f32.mrf.mxu0 }
 0xb80   : > { %1923 = vrot.lane.b32.xlu1 %v2851_v47, %s3191_s15 }
 0xb81   : > { %v1866_v49 = vpop.f32.mrf.mxu0 }
 0xb82   : > { %1921 = vrot.lane.b32.xlu0 %v1866_v49, %s3191_s15 }
 0xb83   : > { %v2854_v51 = vpop.f32.mrf.mxu0 }
 0xb84   : > { %1927 = vrot.lane.b32.xlu1 %v2854_v51, %s3191_s15 }
 0xb85   : > { %v1876_v52 = vpop.f32.mrf.mxu0 }
 0xb86   : > { %1925 = vrot.lane.b32.xlu0 %v1876_v52, %s3191_s15 }
 0xbf2   : > { %v1924_v63 = vpop.permute.xlu1 %1923 }
 0xbf3   : > { %v1943_v6 = vsel %vm1941_vm4, %v1938_v4, %v1924_v63 }
 0xbf4   : > { %v1922_v3 = vpop.permute.xlu0 %1921 }
 0xbf5   : > { %v1942_v5 = vsel %vm1941_vm4, %v1937_v1, %v1922_v3 }
 0xbf6   : > { %2871 = vmatprep.mubr.msk.f32.mxu0 %vm656_vm1, %v1942_v5  ;;  %v1928_v7 = vpop.permute.xlu1 %1927 }
 0xbf7   : > { %2872 = vmatmul.mubr.msk.f32.vlgmr.msra.gmra.mxu0 %vm656_vm1, %v1943_v6  ;;  %v1945_v21 = vsel %vm1941_vm4, %v1940_v18, %v1928_v7 }
 0xbf8   : > { %v1926_v9 = vpop.permute.xlu0 %1925 }
 0xbf9   : > { %v1944_v20 = vsel %vm1941_vm4, %v1939_v25, %v1926_v9 }
 0xbfa   : > { %2874 = vmatprep.mubr.msk.f32.mxu0 %vm656_vm1, %v1944_v20 }
 0xbfb   : > { %2875 = vmatmul.mubr.msk.f32.gmra.mxu0 %vm656_vm1, %v1945_v21  ;;  %v2585_v21 = vld [vmem:[%s3885_s8] ss:$0 sm:$0xff] }
 0xcb7   : > { %v2873_v24 = vpop.f32.mrf.mxu0 }
 0xcb8   : > { %v3734_v30 = vadd.f32 %v2873_v24, %v1954_v23 }
 0xcb9   : > { %v2044_v12 = vpop.f32.mrf.mxu0 }
 0xcba   : > { %v3737_v15 = vadd.f32 %v2044_v12, %v1953_v27  ;;  %v2072_v10 = vsel %vm477_vm0, %v3734_v30, 0.0 }
 0xcbb   : > { %2073 = vadd.xlane.f32.xlu1 %v2072_v10  ;;  %v2876_v50 = vpop.f32.mrf.mxu0 }
 0xcbc   : > { %v2069_v39 = vsel %vm477_vm0, %v3737_v15, 0.0  ;;  %v3745_v38 = vadd.f32 %v2876_v50, %v1956_v53  ;;  %v2304_v50 = vld [vmem:[%s3888_s11 + $0x38] sm:$0xff]  ;;  %v2303_v53 = vld [vmem:[%s3888_s11 + $0x30] sm:$0xff] }
 0xcbd   : > { %2070 = vadd.xlane.f32.xlu0 %v2069_v39  ;;  %v2054_v31 = vpop.f32.mrf.mxu0  ;;  %2891 = vmatprep.subr.mxu1 %v2304_v50  ;;  %v2302_v39 = vld [vmem:[%s3888_s11 + $0x28] sm:$0xff] }
 0xcbe   : > { %v3743_v56 = vadd.f32 %v2054_v31, %v1955_v48  ;;  %v2078_v32 = vsel %vm477_vm0, %v3745_v38, 0.0  ;;  %v2301_v31 = vld [vmem:[%s3888_s11 + $0x20] sm:$0xff] }
 0xcc0   : > { %v2075_v41 = vsel %vm477_vm0, %v3743_v56, 0.0 }
 0xcc1   : > { %2076 = vadd.xlane.f32.xlu0 %v2075_v41  ;;  %v2300_v41 = vld [vmem:[%s3888_s11 + $0x18] sm:$0xff] }
 0xcc5   : > { %2079 = vadd.xlane.f32.xlu0 %v2078_v32  ;;  %v2299_v32 = vld [vmem:[%s3888_s11 + $0x10] sm:$0xff] }
 0xd44   : > { %v2074_v40 = vpop.xlane.xlu1 %2073 }
 0xd45   : > { %v2083_v14 = vmul.f32 0.03125, %v2074_v40  ;;  %v2298_v40 = vld [vmem:[%s3888_s11 + $0x8] sm:$0xff] }
 0xd46   : > { %v2071_v16 = vpop.xlane.xlu0 %2070 }
 0xd47   : > { %v2087_v11 = vsub.f32 %v3734_v30, %v2083_v14  ;;  %v2082_v17 = vmul.f32 0.03125, %v2071_v16  ;;  %v2297_v14 = vld [vmem:[%s3888_s11] sm:$0xff] }
 0xd48   : > { %v2586_v16 = vld [vmem:[%s3887_s10] ss:$0 sm:$0xff] }
 0xd49   : > { %v2086_v33 = vsub.f32 %v3737_v15, %v2082_v17  ;;  %v2091_v34 = vmul.f32 %v2087_v11, %v2087_v11 }
 0xd4a   : > { %v2077_v35 = vpop.xlane.xlu0 %2076 }
 0xd4b   : > { %v2084_v36 = vmul.f32 0.03125, %v2077_v35  ;;  %v2097_v37 = vsel %vm477_vm0, %v2091_v34, 0.0  ;;  %v2090_v42 = vmul.f32 %v2086_v33, %v2086_v33 }
 0xd4c   : > { %2098 = vadd.xlane.f32.xlu1 %v2097_v37 }
 0xd4d   : > { %v2088_v43 = vsub.f32 %v3743_v56, %v2084_v36  ;;  %v2094_v44 = vsel %vm477_vm0, %v2090_v42, 0.0 }
 0xd4e   : > { %2095 = vadd.xlane.f32.xlu0 %v2094_v44  ;;  %v2080_v45 = vpop.xlane.xlu0 %2079 }
 0xd4f   : > { %v2085_v46 = vmul.f32 0.03125, %v2080_v45  ;;  %v2092_v47 = vmul.f32 %v2088_v43, %v2088_v43 }
 0xd51   : > { %v2089_v49 = vsub.f32 %v3745_v38, %v2085_v46  ;;  %v2100_v51 = vsel %vm477_vm0, %v2092_v47, 0.0 }
 0xd52   : > { %2101 = vadd.xlane.f32.xlu0 %v2100_v51 }
 0xd53   : > { %v2093_v52 = vmul.f32 %v2089_v49, %v2089_v49 }
 0xd55   : > { %v2103_v54 = vsel %vm477_vm0, %v2093_v52, 0.0 }
 0xd56   : > { %2104 = vadd.xlane.f32.xlu1 %v2103_v54 }
 0xdd5   : > { %v2099_v60 = vpop.xlane.xlu1 %2098 }
 0xdd6   : > { %v2107_v61 = vmul.f32 0.03125, %v2099_v60 }
 0xdd7   : > { %v2096_v62 = vpop.xlane.xlu0 %2095 }
 0xdd8   : > { %v2111_v63 = vadd.f32 1e-05, %v2107_v61  ;;  %v2106_v0 = vmul.f32 0.03125, %v2096_v62 }
 0xdda   : > { %3060 = vrsqrt.f32 %v2111_v63  ;;  %v2110_v1 = vadd.f32 1e-05, %v2106_v0 }
 0xddb   : > { %v2102_v2 = vpop.xlane.xlu0 %2101 }
 0xddc   : > { %3062 = vrsqrt.f32 %v2110_v1  ;;  %v2108_v3 = vmul.f32 0.03125, %v2102_v2 }
 0xdde   : > { %v2112_v4 = vadd.f32 1e-05, %v2108_v3 }
 0xddf   : > { %v2105_v5 = vpop.xlane.xlu1 %2104 }
 0xde0   : > { %3064 = vrsqrt.f32 %v2112_v4  ;;  %v2109_v6 = vmul.f32 0.03125, %v2105_v5 }
 0xde2   : > { %v2113_v26 = vadd.f32 1e-05, %v2109_v6 }
 0xde4   : > { %3066 = vrsqrt.f32 %v2113_v26 }
 0xde7   : > { %v3061_v7 = vpop.eup %3060 }
 0xde8   : > { %v2119_v25 = vmul.f32 %v3061_v7, %v2087_v11 }
 0xde9   : > { %v3063_v9 = vpop.eup %3062 }
 0xdea   : > { %v2118_v18 = vmul.f32 %v3063_v9, %v2086_v33  ;;  %v2129_v20 = vmul.f32 %v2584_v8, %v2119_v25 }
 0xdec   : > { %v2128_v28 = vmul.f32 %v2584_v8, %v2118_v18  ;;  %v2139_v27 = vadd.f32 %v2585_v21, %v2129_v20 }
 0xded   : > { %v3065_v22 = vpop.eup %3064 }
 0xdee   : > { %v2138_v19 = vadd.f32 %v2585_v21, %v2128_v28  ;;  %v2120_v23 = vmul.f32 %v3065_v22, %v2088_v43 }
 0xdf0   : > { %2885 = vmatprep.mubr.msk.f32.mxu1 %vm477_vm0, %v2138_v19  ;;  %v2130_v24 = vmul.f32 %v2584_v8, %v2120_v23 }
 0xdf1   : > { %v3067_v29 = vpop.eup %3066  ;;  %2886 = vmatmul.mubr.msk.f32.vlgmr.msra.gmra.mxu1 %vm477_vm0, %v2139_v27  ;;  %v2591_v27 = vld [vmem:[%s3889_s12] ss:$0 sm:$0xff] }
 0xdf2   : > { %v2140_v12 = vadd.f32 %v2585_v21, %v2130_v24  ;;  %v2121_v13 = vmul.f32 %v3067_v29, %v2089_v49  ;;  %2892 = vmatpush3.msra.mxu1 %v2304_v50  ;;  %v2294_v24 = vadd.f32 %v2591_v27, %v3734_v30  ;;  %v2296_v50 = vadd.f32 %v2591_v27, %v3745_v38 }
 0xdf3   : > { %2893 = vmatprep.subr.mxu1 %v2303_v53  ;;  %v2295_v30 = vadd.f32 %v2591_v27, %v3743_v56 }
 0xdf4   : > { %2888 = vmatprep.mubr.msk.f32.mxu1 %vm477_vm0, %v2140_v12  ;;  %v2131_v10 = vmul.f32 %v2584_v8, %v2121_v13  ;;  %2894 = vmatpush3.msra.mxu1 %v2303_v53  ;;  %v2293_v13 = vadd.f32 %v2591_v27, %v3737_v15 }
 0xdf5   : > { %2895 = vmatprep.subr.mxu1 %v2302_v39 }
 0xdf6   : > { %v2141_v48 = vadd.f32 %v2585_v21, %v2131_v10  ;;  %2896 = vmatpush3.msra.mxu1 %v2302_v39 }
 0xdf7   : > { %2897 = vmatprep.subr.mxu1 %v2301_v31 }
 0xdf8   : > { %2889 = vmatmul.mubr.msk.f32.gmra.mxu1 %vm477_vm0, %v2141_v48 }
 0xdf9   : > { %2898 = vmatpush3.msra.mxu1 %v2301_v31 }
 0xdfa   : > { %2899 = vmatprep.subr.mxu1 %v2300_v41 }
 0xdfb   : > { %2900 = vmatpush3.msra.mxu1 %v2300_v41 }
 0xdfc   : > { %2901 = vmatprep.subr.mxu1 %v2299_v32 }
 0xdfd   : > { %2902 = vmatpush3.msra.mxu1 %v2299_v32 }
 0xdfe   : > { %2903 = vmatprep.subr.mxu1 %v2298_v40 }
 0xdff   : > { %2904 = vmatpush3.msra.mxu1 %v2298_v40 }
 0xe00   : > { %2905 = vmatprep.subr.mxu1 %v2297_v14 }
 0xe01   : > { %2906 = vmatpush3.msra.mxu1 %v2297_v14 }
 0xeb1   : > { %v2887_v11 = vpop.f32.mrf.mxu1 }
 0xeb2   : > { %v2237_v17 = vadd.f32 %v2887_v11, %v2586_v16 }
 0xeb3   : > { %v2231_v33 = vpop.f32.mrf.mxu1 }
 0xeb4   : > { %v2255_v34 = vmul.f32 0.044715, %v2237_v17  ;;  %v2232_v35 = vadd.f32 %v2586_v16, %v2231_v33  ;;  %v2251_v7 = vmul.f32 0.5, %v2237_v17 }
 0xeb6   : > { %v2259_v36 = vmul.f32 %v2255_v34, %v2237_v17  ;;  %v2254_v37 = vmul.f32 0.044715, %v2232_v35  ;;  %v2250_v6 = vmul.f32 0.5, %v2232_v35 }
 0xeb8   : > { %v2263_v42 = vmul.f32 %v2259_v36, %v2237_v17  ;;  %v2258_v43 = vmul.f32 %v2254_v37, %v2232_v35  ;;  %v2890_v44 = vpop.f32.mrf.mxu1 }
 0xeb9   : > { %v2247_v45 = vadd.f32 %v2890_v44, %v2586_v16 }
 0xeba   : > { %v2267_v46 = vadd.f32 %v2263_v42, %v2237_v17  ;;  %v2262_v47 = vmul.f32 %v2258_v43, %v2232_v35  ;;  %v2241_v49 = vpop.f32.mrf.mxu1 }
 0xebb   : > { %v2257_v51 = vmul.f32 0.044715, %v2247_v45  ;;  %v2242_v52 = vadd.f32 %v2586_v16, %v2241_v49  ;;  %v2253_v22 = vmul.f32 0.5, %v2247_v45 }
 0xebc   : > { %v2271_v54 = vmul.f32 0.7978846, %v2267_v46  ;;  %v2266_v55 = vadd.f32 %v2262_v47, %v2232_v35 }
 0xebd   : > { %v2261_v57 = vmul.f32 %v2257_v51, %v2247_v45  ;;  %v2256_v58 = vmul.f32 0.044715, %v2242_v52  ;;  %v2252_v21 = vmul.f32 0.5, %v2242_v52 }
 0xebe   : > { %3068 = vtanh.f32 %v2271_v54  ;;  %v2270_v59 = vmul.f32 0.7978846, %v2266_v55 }
 0xebf   : > { %v2265_v60 = vmul.f32 %v2261_v57, %v2247_v45  ;;  %v2260_v61 = vmul.f32 %v2256_v58, %v2242_v52 }
 0xec0   : > { %3070 = vtanh.f32 %v2270_v59 }
 0xec1   : > { %v2269_v62 = vadd.f32 %v2265_v60, %v2247_v45  ;;  %v2264_v63 = vmul.f32 %v2260_v61, %v2242_v52 }
 0xec3   : > { %v2268_v0 = vadd.f32 %v2264_v63, %v2242_v52  ;;  %v2273_v1 = vmul.f32 0.7978846, %v2269_v62 }
 0xec5   : > { %v2272_v2 = vmul.f32 0.7978846, %v2268_v0  ;;  %3072 = vtanh.f32 %v2273_v1 }
 0xec7   : > { %3074 = vtanh.f32 %v2272_v2 }
 0xecb   : > { %v3069_v3 = vpop.eup %3068 }
 0xecc   : > { %v2279_v5 = vadd.f32 1.0, %v3069_v3 }
 0xecd   : > { %v3071_v4 = vpop.eup %3070 }
 0xece   : > { %v2278_v26 = vadd.f32 1.0, %v3071_v4  ;;  %v2283_v8 = vmul.f32 %v2279_v5, %v2251_v7 }
 0xed0   : > { %v2282_v25 = vmul.f32 %v2278_v26, %v2250_v6 }
 0xed2   : > { %v3073_v9 = vpop.eup %3072  ;;  %2907 = vmatprep.mubr.msk.f32.mxu1 %vm656_vm1, %v2282_v25 }
 0xed3   : > { %2908 = vmatmul.mubr.msk.f32.vlgmr.msra.gmra.mxu1 %vm656_vm1, %v2283_v8  ;;  %v2281_v20 = vadd.f32 1.0, %v3073_v9 }
 0xed4   : > { %v3075_v18 = vpop.eup %3074 }
 0xed5   : > { %v2280_v28 = vadd.f32 1.0, %v3075_v18  ;;  %v2285_v23 = vmul.f32 %v2281_v20, %v2253_v22 }
 0xed7   : > { %v2284_v19 = vmul.f32 %v2280_v28, %v2252_v21 }
 0xed9   : > { %2910 = vmatprep.mubr.msk.f32.mxu1 %vm656_vm1, %v2284_v19 }
 0xeda   : > { %2911 = vmatmul.mubr.msk.f32.gmra.mxu1 %vm656_vm1, %v2285_v23 }
 0xf93   : > { %v2909_v29 = vpop.f32.mrf.mxu1 }
 0xf94   : > { %v2403_v12 = vadd.f32 %v2909_v29, %v2294_v24 }
 0xf95   : > { %v2383_v10 = vpop.f32.mrf.mxu1 }
 0xf96   : > { %2407 = vst.msk [vmem:[%s460_s16 + $0x8] sm:$0xff] %vm477_vm0, %v2403_v12  ;;  %v2402_v48 = vadd.f32 %v2383_v10, %v2293_v13 }
 0xf98   : > { %2406 = vst.msk [vmem:[%s460_s16] sm:$0xff] %vm477_vm0, %v2402_v48 }
 0xf9a   : > { %v2912_v53 = vpop.f32.mrf.mxu1 }
 0xf9b   : > { %v2405_v39 = vadd.f32 %v2912_v53, %v2296_v50 }
 0xf9c   : > { %v2393_v15 = vpop.f32.mrf.mxu1 }
 0xf9d   : > { %2409 = vst.msk [vmem:[%s460_s16 + $0x18] sm:$0xff] %vm477_vm0, %v2405_v39  ;;  %v2404_v31 = vadd.f32 %v2393_v15, %v2295_v30 }
 0xf9f   : > { %2408 = vst.msk [vmem:[%s460_s16 + $0x10] sm:$0xff] %vm477_vm0, %v2404_v31 }
 0xfa0   : > { %3115 = shalt.err (!%p3112_p3)
}
 0xfa1   : > { %s3116_s21 = scalar_lea.hbm %s3829_s24, 512  ;;  %s3120_s15 = scalar_lea.hbm %s3890_s13, 1024 }
 0xfa2   : > { %p3117_p5 = scmp.ne.s32.totalorder %s3829_s24, %s3116_s21  ;;  %p3121_p9 = scmp.lt.s32.totalorder %s3829_s24, %s3890_s13 }
 0xfa3   : > { %p3122_p12 = scmp.lt.s32.totalorder %s3120_s15, %s3116_s21 }
 0xfa4   : > { %p3118_p6 = pnand %p3117_p5, %p3305_p4 }
 0xfa5   : > { %p3123_p10 = por %p3122_p12, %p3121_p9 }
 0xfa6   : > { %p3119_p7 = pneg %p3118_p6 }
 0xfa8   : > { %p3124_p11 = pnand %p3123_p10, %p3119_p7 }
 0xfaa   : > { %3127 = shalt.err (!%p3124_p11)
}
 0xfab   : > { %s3193_s0 = smov 128   ;;  %s3194_s17 = smov 8  }
 0xfac   : > { %2917 = dma.vmem_to_hbm [thread:$0]  (%p3305_p4), %s3823_s22, 512, %s3829_s24, %s3832_s28, %s3193_s0, %s3193_s0, %s3194_s17  }
 0xfad PF: > { %p2929_p13 = scmp.ge.s32.totalorder %s3182_s30, 2  ;;  %s2441_s29 = sand.u32 1, %s3162_s25  }
 0xfae   : > { %s2442_s21 = scalar_lea.sflag [#allocation7], %s2441_s29 }
 0xfaf   : > { %p2924_p0 = pnand %p2929_p13, %p3312_p8 }
 0xfb1   : > { %p2925_p1 = pneg %p2924_p0 }
 0xfb3   : > { %3157 = dma.done.wait (%p2925_p1), %s2442_s21, 512  }
 0xfb4   : > { %3159 = vsyncadd (%p2925_p1), %s2442_s21, 4294966784  ;;  %s27_s30 = sadd.s32 1, %s3182_s30   ;;  %s3902_s16 = sld [smem:[#allocation13_spill]] }
 0xfb5   : > { %p24_p2 = scmp.ge.s32.totalorder %s27_s30, 4   ;;  %s3903_s28 = sld [smem:[#allocation11_spill]] }
 0xfb6   : > { %s3904_s29 = sld [smem:[#allocation12_spill]]  ;;  %s3905_s25 = smov %s3166_s26 }
 0xfb7   : > { %s3906_s26 = smov %s3170_s27  ;;  %26 = sbr.rel (!%p24_p2) target bundleno = 7 (0x7), region = 116 }
 0xfba   : > { %s3907_s27 = smov %s3902_s16 }
 0xfbc   :  { %2447 = vsyncpa [#allocation6], 1 }
 0xfbd   :  { %2449 = vsyncpa [#allocation6 + $0x1], 1 }
 0xfbe   :  { %2450 = vsyncpa [#allocation7], 1 }
 0xfbf   :  { %2452 = vsyncpa [#allocation7 + $0x1], 1 }

</bundles_post_ra>
